<compile_context>
chip_gen: v5e
topology: v5e:2x2
jax: 0.10.0
libtpu: 0.0.40
codegen_flags: <defaults>
</compile_context>

<pallas_src>
import jax
import jax.numpy as jnp
from jax.experimental import pallas as pl
from jax.experimental.pallas import tpu as pltpu


# ----------------------------------------------------------------------------
# Fused (W @ patches + shift -> act [+ residual]) Pallas kernel, transposed layout
# ----------------------------------------------------------------------------
def _make_kernel(act, has_residual):
    def affine_act(acc, b_ref):
        y = acc + b_ref[...]                       # (N, tm) + (N, 1) broadcast, f32
        if act == "relu":
            y = jnp.maximum(y, 0.0)
        elif act == "tanh":
            y = jnp.tanh(y)
        return y

    if has_residual:
        def kernel(w_ref, p_ref, b_ref, r_ref, o_ref):
            acc = jnp.dot(w_ref[...], p_ref[...],
                          preferred_element_type=jnp.float32)
            o_ref[...] = (affine_act(acc, b_ref) + r_ref[...]).astype(o_ref.dtype)
        return kernel

    def kernel(w_ref, p_ref, b_ref, o_ref):
        acc = jnp.dot(w_ref[...], p_ref[...],
                      preferred_element_type=jnp.float32)
        o_ref[...] = affine_act(acc, b_ref).astype(o_ref.dtype)
    return kernel


def fused_matmul_T(w_t, patches_t, shift, act, residual=None):
    """out[n, m] = act(sum_k w_t[n,k] * patches_t[k,m] + shift[n]) (+ residual[n,m]).

    w_t: [N, K] bf16 (scale-folded), patches_t: [K, M] bf16, shift: [N] f32.
    Output: [N, M] f32 with the large M dimension on lanes (lane-dense stores).
    """
    N, K = w_t.shape
    M = patches_t.shape[1]
    # <=2 grid steps: full-M block, or a 2-way lane-aligned split so both v7x
    # TensorCores get work (v5e/v6e: the 2 steps are just a cheap serial loop).
    nsplit = 2 if (M % 256 == 0) else 1
    tm = M // nsplit

    shift2 = shift.reshape(N, 1).astype(jnp.float32)

    in_specs = [
        pl.BlockSpec((N, K), lambda i: (0, 0)),      # weights, resident
        pl.BlockSpec((K, tm), lambda i: (0, i)),     # patches tile (lanes = M)
        pl.BlockSpec((N, 1), lambda i: (0, 0)),      # folded BN shift
    ]
    args = [w_t, patches_t, shift2]
    has_res = residual is not None
    if has_res:
        in_specs.append(pl.BlockSpec((N, tm), lambda i: (0, i)))
        args.append(residual)

    return pl.pallas_call(
        _make_kernel(act, has_res),
        out_shape=jax.ShapeDtypeStruct((N, M), jnp.float32),
        grid=(nsplit,),
        in_specs=in_specs,
        out_specs=pl.BlockSpec((N, tm), lambda i: (0, i)),
        compiler_params=pltpu.CompilerParams(dimension_semantics=("parallel",)),
    )(*args)


# ----------------------------------------------------------------------------
# im2col glue (channels-first layout) + layer wrappers
# ----------------------------------------------------------------------------
def _im2col_cf(x, k, stride, pad):
    """x: [C, B, H, W] -> patches_T [k*k*C, B*Ho*Wo] (row order: dh, dw, ci)."""
    C, B, H, W = x.shape
    xp = jnp.pad(x, ((0, 0), (0, 0), (pad, pad), (pad, pad)))
    Ho = (H + 2 * pad - k) // stride + 1
    Wo = (W + 2 * pad - k) // stride + 1
    cols = []
    for dh in range(k):
        for dw in range(k):
            cols.append(xp[:, :, dh:dh + stride * (Ho - 1) + 1:stride,
                              dw:dw + stride * (Wo - 1) + 1:stride])
    patches = jnp.stack(cols, axis=0)                 # [k*k, C, B, Ho, Wo]
    return patches.reshape(k * k * C, B * Ho * Wo), Ho, Wo
    # TODO(synk): for the 3x3 residual layers the patch tensor is still built by
    #             XLA (9x duplication); fusing the halo gather into the kernel via
    #             an (Ho,Wo)-tiled index_map would remove that HBM round-trip.


def conv_fused(x, p, k, stride, pad, act, residual=None):
    """Regular conv (also used for stride-1 transposed convs with pre-flipped weights)."""
    C, B, H, W = x.shape
    patches, Ho, Wo = _im2col_cf(x, k, stride, pad)
    res = None if residual is None else residual.reshape(residual.shape[0], -1)
    out = fused_matmul_T(p["w_t"], patches.astype(jnp.bfloat16), p["shift"], act, res)
    return out.reshape(out.shape[0], B, Ho, Wo)


def convT_s2_fused(x, p, act="relu"):
    """ConvTranspose2d(k=4, s=2, p=1) via sub-pixel (parity) decomposition.

    One 3x3-tap im2col on the undilated input; combined weight [4*Cout, 9*Cin]
    computes all four output parities at once; pixel-shuffle interleaves them.
    """
    C, B, H, W = x.shape
    patches, _, _ = _im2col_cf(x, 3, 1, 1)            # [9*C, B*H*W]
    out = fused_matmul_T(p["w_t"], patches.astype(jnp.bfloat16), p["shift"], act)
    cout = out.shape[0] // 4
    y = out.reshape(2, 2, cout, B, H, W)              # (ph, pw, co, b, h, w)
    y = jnp.transpose(y, (2, 3, 4, 0, 5, 1))          # (co, b, h, ph, w, pw)
    return y.reshape(cout, B, 2 * H, 2 * W)


# ----------------------------------------------------------------------------
# Deterministic parameter init + BatchNorm folding + weight precomputation
# ----------------------------------------------------------------------------
def _bn_fold(bias, gamma, beta, mean, var, eps=1e-5):
    scale = gamma / jnp.sqrt(var + eps)
    shift = beta + (bias - mean) * scale
    return scale, shift


def _raw_block(key, cin, cout, k, transpose=True, bn=True):
    k1, k2, k3, k4, k5, k6 = jax.random.split(key, 6)
    wshape = (cin, cout, k, k) if transpose else (cout, cin, k, k)  # PyTorch layouts
    w = 0.1 * jax.random.normal(k1, wshape, jnp.float32)
    b = 0.05 * jax.random.normal(k2, (cout,), jnp.float32)
    if bn:
        gamma = 1.0 + 0.1 * jax.random.normal(k3, (cout,), jnp.float32)
        beta = 0.05 * jax.random.normal(k4, (cout,), jnp.float32)
        mean = 0.02 * jax.random.normal(k5, (cout,), jnp.float32)
        var = 1.0 + 0.1 * jnp.abs(jax.random.normal(k6, (cout,), jnp.float32))
        scale, shift = _bn_fold(b, gamma, beta, mean, var)
    else:
        scale, shift = jnp.ones((cout,), jnp.float32), b
    return w, scale, shift


def _make_convT_s2_params(key, cin, cout):
    """ConvTranspose2d(k=4,s=2,p=1) -> combined parity weight [4*cout, 9*cin]."""
    w, scale, shift = _raw_block(key, cin, cout, 4, transpose=True, bn=True)
    # (parity, tap) -> original kernel index; missing entries are zero taps.
    kmap = {(0, 0): 3, (0, 1): 1, (1, 1): 2, (1, 2): 0}
    zeros = jnp.zeros((cin, cout), jnp.float32)
    rows = []
    for dh in range(3):
        for dw in range(3):
            cols = []
            for ph in range(2):
                for pw in range(2):
                    if (ph, dh) in kmap and (pw, dw) in kmap:
                        cols.append(w[:, :, kmap[(ph, dh)], kmap[(pw, dw)]])
                    else:
                        cols.append(zeros)
            rows.append(jnp.concatenate(cols, axis=1))        # [cin, 4*cout]
    wbig = jnp.concatenate(rows, axis=0)                      # [9*cin, 4*cout]
    wbig = wbig * jnp.tile(scale, 4)[None, :]                 # fold BN scale
    return {"w_t": jnp.transpose(wbig).astype(jnp.bfloat16),  # [4*cout, 9*cin]
            "shift": jnp.tile(shift, 4)}


def _make_convT_s1_params(key, cin, cout, k, bn=True):
    """Stride-1 ConvTranspose2d(k, p=k-1-? standard) == conv with flipped, swapped kernel."""
    w, scale, shift = _raw_block(key, cin, cout, k, transpose=True, bn=bn)
    w_conv = jnp.flip(w, axis=(2, 3))                         # [cin, cout, k, k]
    w_t = jnp.transpose(w_conv, (1, 2, 3, 0)).reshape(cout, k * k * cin)
    return {"w_t": (w_t * scale[:, None]).astype(jnp.bfloat16), "shift": shift}


def _make_conv_params(key, cin, cout, k):
    w, scale, shift = _raw_block(key, cin, cout, k, transpose=False, bn=True)
    w_t = jnp.transpose(w, (0, 2, 3, 1)).reshape(cout, k * k * cin)
    return {"w_t": (w_t * scale[:, None]).astype(jnp.bfloat16), "shift": shift}


def init_generator_params(key):
    keys = jax.random.split(key, 14)
    return {
        "t1": _make_convT_s2_params(keys[0], 2, 8),
        "t1_res": [_make_convT_s1_params(keys[1 + i], 8, 8, 3) for i in range(4)],
        "t2": _make_convT_s2_params(keys[5], 8, 16),
        "t2_res": [_make_convT_s1_params(keys[6 + i], 16, 16, 3) for i in range(4)],
        "t3": _make_convT_s2_params(keys[10], 16, 8),
        "t4": _make_conv_params(keys[11], 8, 4, 4),
        "t5": _make_convT_s2_params(keys[12], 4, 3),
        "t6": _make_convT_s1_params(keys[13], 3, 3, 1, bn=False),
    }


# ----------------------------------------------------------------------------
# Generator forward
# ----------------------------------------------------------------------------
def generator_forward(x_nchw, params):
    # NCHW -> internal [C, B, H, W]
    x = jnp.transpose(x_nchw, (1, 0, 2, 3)).astype(jnp.float32)

    x = convT_s2_fused(x, params["t1"])                                  # 2 -> 8, 2x up
    for p in params["t1_res"]:
        x = conv_fused(x, p, k=3, stride=1, pad=1, act="relu", residual=x)

    x = convT_s2_fused(x, params["t2"])                                  # 8 -> 16, 2x up
    for p in params["t2_res"]:
        x = conv_fused(x, p, k=3, stride=1, pad=1, act="relu", residual=x)

    x = convT_s2_fused(x, params["t3"])                                  # 16 -> 8, 2x up
    x = conv_fused(x, params["t4"], k=4, stride=2, pad=1, act="relu")    # 8 -> 4, 2x down
    x = convT_s2_fused(x, params["t5"])                                  # 4 -> 3, 2x up
    x = conv_fused(x, params["t6"], k=1, stride=1, pad=0, act="tanh")    # 3 -> 3, tanh

    # internal [C, B, H, W] -> NCHW
    return jnp.transpose(x, (1, 0, 2, 3))


# ----------------------------------------------------------------------------
if __name__ == "__main__":
    key = jax.random.PRNGKey(0)
    k_in, k_par = jax.random.split(key)

    # small input consistent with the module: [B=2, C=2, H=4, W=4]
    x = jax.random.normal(k_in, (2, 2, 4, 4), jnp.float32)
    params = init_generator_params(k_par)

    fwd = jax.jit(generator_forward)
    out = jax.block_until_ready(fwd(x, params))

    # overall upsampling: H,W -> 8H, 8W ; channels 2 -> 3
    assert out.shape == (2, 3, 32, 32), out.shape
    assert bool(jnp.all(jnp.isfinite(out)))
    assert bool(jnp.all(jnp.abs(out) <= 1.0 + 1e-6))  # final tanh

    print("KERNEL_OK")
</pallas_src>

<mosaic_0001>
module attributes {stable_mosaic.version = 11 : i64} {
  func.func @kernel(%arg0: i32, %arg1: memref<32x18xbf16, #tpu.memory_space<vmem>>, %arg2: memref<18x32xbf16, #tpu.memory_space<vmem>>, %arg3: memref<32x1xf32, #tpu.memory_space<vmem>>, %arg4: memref<32x32xf32, #tpu.memory_space<vmem>>) attributes {dimension_semantics = [#tpu.dimension_semantics<parallel>], iteration_bounds = array<i64: 1>, scalar_prefetch = 0 : i64, scratch_operands = 0 : i64, tpu.core_type = #tpu.core_type<tc>, window_params = [{pipeline_mode = #tpu.pipeline_mode<synchronous>, transform_indices = @transform_0, window_bounds = array<i64: 32, 18>}, {transform_indices = @transform_1, window_bounds = array<i64: 18, 32>}, {pipeline_mode = #tpu.pipeline_mode<synchronous>, transform_indices = @transform_2, window_bounds = array<i64: 32, 1>}, {transform_indices = @transform_3, window_bounds = array<i64: 32, 32>}]} {
    %c0 = arith.constant 0 : index
    %c0_0 = arith.constant 0 : index
    %0 = vector.load %arg1[%c0, %c0_0] : memref<32x18xbf16, #tpu.memory_space<vmem>>, vector<32x18xbf16>
    %c0_1 = arith.constant 0 : index
    %c0_2 = arith.constant 0 : index
    %1 = vector.load %arg2[%c0_1, %c0_2] : memref<18x32xbf16, #tpu.memory_space<vmem>>, vector<18x32xbf16>
    %cst = arith.constant dense<0.000000e+00> : vector<32x32xf32>
    %2 = tpu.matmul %0, %1, %cst {dimension_numbers = #tpu.dot_dimension_numbers<[1], [0], [0], [1], [0, 0, 1, 1], [], []>} : vector<32x18xbf16>, vector<18x32xbf16>, vector<32x32xf32> -> vector<32x32xf32>
    %c0_3 = arith.constant 0 : index
    %c0_4 = arith.constant 0 : index
    %3 = vector.load %arg3[%c0_3, %c0_4] : memref<32x1xf32, #tpu.memory_space<vmem>>, vector<32x1xf32>
    %4 = vector.broadcast %3 : vector<32x1xf32> to vector<32x32xf32>
    %5 = arith.addf %2, %4 : vector<32x32xf32>
    %cst_5 = arith.constant 0.000000e+00 : f32
    %6 = vector.broadcast %cst_5 : f32 to vector<32x32xf32>
    %7 = arith.maximumf %5, %6 : vector<32x32xf32>
    %c0_6 = arith.constant 0 : index
    %c0_7 = arith.constant 0 : index
    %8 = vector.load %arg4[%c0_6, %c0_7] : memref<32x32xf32, #tpu.memory_space<vmem>>, vector<32x32xf32>
    tpu.vector_store %arg4[%c0_6, %c0_7], %7 {strides = array<i32>} : memref<32x32xf32, #tpu.memory_space<vmem>>, vector<32x32xf32>,
    return
  }
  func.func @transform_0(%arg0: i32) -> (i32, i32) {
    %c0_i32 = arith.constant 0 : i32
    %c0_i32_0 = arith.constant 0 : i32
    %c0_i32_1 = arith.constant 0 : i32
    return %c0_i32, %c0_i32_0 : i32, i32
  }
  func.func @transform_1(%arg0: i32) -> (i32, i32) {
    %c0_i32 = arith.constant 0 : i32
    %c0_i32_0 = arith.constant 0 : i32
    return %c0_i32, %arg0 : i32, i32
  }
  func.func @transform_2(%arg0: i32) -> (i32, i32) {
    %c0_i32 = arith.constant 0 : i32
    %c0_i32_0 = arith.constant 0 : i32
    %c0_i32_1 = arith.constant 0 : i32
    return %c0_i32, %c0_i32_0 : i32, i32
  }
  func.func @transform_3(%arg0: i32) -> (i32, i32) {
    %c0_i32 = arith.constant 0 : i32
    %c0_i32_0 = arith.constant 0 : i32
    return %c0_i32, %arg0 : i32, i32
  }
}

module attributes {stable_mosaic.version = 11 : i64} {
  func.func @kernel(%arg0: i32, %arg1: memref<8x72xbf16, #tpu.memory_space<vmem>>, %arg2: memref<72x128xbf16, #tpu.memory_space<vmem>>, %arg3: memref<8x1xf32, #tpu.memory_space<vmem>>, %arg4: memref<8x128xf32, #tpu.memory_space<vmem>>, %arg5: memref<8x128xf32, #tpu.memory_space<vmem>>) attributes {dimension_semantics = [#tpu.dimension_semantics<parallel>], iteration_bounds = array<i64: 1>, scalar_prefetch = 0 : i64, scratch_operands = 0 : i64, tpu.core_type = #tpu.core_type<tc>, window_params = [{pipeline_mode = #tpu.pipeline_mode<synchronous>, transform_indices = @transform_0, window_bounds = array<i64: 8, 72>}, {transform_indices = @transform_1, window_bounds = array<i64: 72, 128>}, {pipeline_mode = #tpu.pipeline_mode<synchronous>, transform_indices = @transform_2, window_bounds = array<i64: 8, 1>}, {transform_indices = @transform_3, window_bounds = array<i64: 8, 128>}, {transform_indices = @transform_4, window_bounds = array<i64: 8, 128>}]} {
    %c0 = arith.constant 0 : index
    %c0_0 = arith.constant 0 : index
    %0 = vector.load %arg1[%c0, %c0_0] : memref<8x72xbf16, #tpu.memory_space<vmem>>, vector<8x72xbf16>
    %c0_1 = arith.constant 0 : index
    %c0_2 = arith.constant 0 : index
    %1 = vector.load %arg2[%c0_1, %c0_2] : memref<72x128xbf16, #tpu.memory_space<vmem>>, vector<72x128xbf16>
    %cst = arith.constant dense<0.000000e+00> : vector<8x128xf32>
    %2 = tpu.matmul %0, %1, %cst {dimension_numbers = #tpu.dot_dimension_numbers<[1], [0], [0], [1], [0, 0, 1, 1], [], []>} : vector<8x72xbf16>, vector<72x128xbf16>, vector<8x128xf32> -> vector<8x128xf32>
    %c0_3 = arith.constant 0 : index
    %c0_4 = arith.constant 0 : index
    %3 = vector.load %arg3[%c0_3, %c0_4] : memref<8x1xf32, #tpu.memory_space<vmem>>, vector<8x1xf32>
    %4 = vector.broadcast %3 : vector<8x1xf32> to vector<8x128xf32>
    %5 = arith.addf %2, %4 : vector<8x128xf32>
    %cst_5 = arith.constant 0.000000e+00 : f32
    %6 = vector.broadcast %cst_5 : f32 to vector<8x128xf32>
    %7 = arith.maximumf %5, %6 : vector<8x128xf32>
    %c0_6 = arith.constant 0 : index
    %c0_7 = arith.constant 0 : index
    %8 = vector.load %arg4[%c0_6, %c0_7] : memref<8x128xf32, #tpu.memory_space<vmem>>, vector<8x128xf32>
    %9 = arith.addf %7, %8 : vector<8x128xf32>
    %c0_8 = arith.constant 0 : index
    %c0_9 = arith.constant 0 : index
    %10 = vector.load %arg5[%c0_8, %c0_9] : memref<8x128xf32, #tpu.memory_space<vmem>>, vector<8x128xf32>
    tpu.vector_store %arg5[%c0_8, %c0_9], %9 {strides = array<i32>} : memref<8x128xf32, #tpu.memory_space<vmem>>, vector<8x128xf32>,
    return
  }
  func.func @transform_0(%arg0: i32) -> (i32, i32) {
    %c0_i32 = arith.constant 0 : i32
    %c0_i32_0 = arith.constant 0 : i32
    %c0_i32_1 = arith.constant 0 : i32
    return %c0_i32, %c0_i32_0 : i32, i32
  }
  func.func @transform_1(%arg0: i32) -> (i32, i32) {
    %c0_i32 = arith.constant 0 : i32
    %c0_i32_0 = arith.constant 0 : i32
    return %c0_i32, %arg0 : i32, i32
  }
  func.func @transform_2(%arg0: i32) -> (i32, i32) {
    %c0_i32 = arith.constant 0 : i32
    %c0_i32_0 = arith.constant 0 : i32
    %c0_i32_1 = arith.constant 0 : i32
    return %c0_i32, %c0_i32_0 : i32, i32
  }
  func.func @transform_3(%arg0: i32) -> (i32, i32) {
    %c0_i32 = arith.constant 0 : i32
    %c0_i32_0 = arith.constant 0 : i32
    return %c0_i32, %arg0 : i32, i32
  }
  func.func @transform_4(%arg0: i32) -> (i32, i32) {
    %c0_i32 = arith.constant 0 : i32
    %c0_i32_0 = arith.constant 0 : i32
    return %c0_i32, %arg0 : i32, i32
  }
}

module attributes {stable_mosaic.version = 11 : i64} {
  func.func @kernel(%arg0: i32, %arg1: memref<64x72xbf16, #tpu.memory_space<vmem>>, %arg2: memref<72x128xbf16, #tpu.memory_space<vmem>>, %arg3: memref<64x1xf32, #tpu.memory_space<vmem>>, %arg4: memref<64x128xf32, #tpu.memory_space<vmem>>) attributes {dimension_semantics = [#tpu.dimension_semantics<parallel>], iteration_bounds = array<i64: 1>, scalar_prefetch = 0 : i64, scratch_operands = 0 : i64, tpu.core_type = #tpu.core_type<tc>, window_params = [{pipeline_mode = #tpu.pipeline_mode<synchronous>, transform_indices = @transform_0, window_bounds = array<i64: 64, 72>}, {transform_indices = @transform_1, window_bounds = array<i64: 72, 128>}, {pipeline_mode = #tpu.pipeline_mode<synchronous>, transform_indices = @transform_2, window_bounds = array<i64: 64, 1>}, {transform_indices = @transform_3, window_bounds = array<i64: 64, 128>}]} {
    %c0 = arith.constant 0 : index
    %c0_0 = arith.constant 0 : index
    %0 = vector.load %arg1[%c0, %c0_0] : memref<64x72xbf16, #tpu.memory_space<vmem>>, vector<64x72xbf16>
    %c0_1 = arith.constant 0 : index
    %c0_2 = arith.constant 0 : index
    %1 = vector.load %arg2[%c0_1, %c0_2] : memref<72x128xbf16, #tpu.memory_space<vmem>>, vector<72x128xbf16>
    %cst = arith.constant dense<0.000000e+00> : vector<64x128xf32>
    %2 = tpu.matmul %0, %1, %cst {dimension_numbers = #tpu.dot_dimension_numbers<[1], [0], [0], [1], [0, 0, 1, 1], [], []>} : vector<64x72xbf16>, vector<72x128xbf16>, vector<64x128xf32> -> vector<64x128xf32>
    %c0_3 = arith.constant 0 : index
    %c0_4 = arith.constant 0 : index
    %3 = vector.load %arg3[%c0_3, %c0_4] : memref<64x1xf32, #tpu.memory_space<vmem>>, vector<64x1xf32>
    %4 = vector.broadcast %3 : vector<64x1xf32> to vector<64x128xf32>
    %5 = arith.addf %2, %4 : vector<64x128xf32>
    %cst_5 = arith.constant 0.000000e+00 : f32
    %6 = vector.broadcast %cst_5 : f32 to vector<64x128xf32>
    %7 = arith.maximumf %5, %6 : vector<64x128xf32>
    %c0_6 = arith.constant 0 : index
    %c0_7 = arith.constant 0 : index
    %8 = vector.load %arg4[%c0_6, %c0_7] : memref<64x128xf32, #tpu.memory_space<vmem>>, vector<64x128xf32>
    tpu.vector_store %arg4[%c0_6, %c0_7], %7 {strides = array<i32>} : memref<64x128xf32, #tpu.memory_space<vmem>>, vector<64x128xf32>,
    return
  }
  func.func @transform_0(%arg0: i32) -> (i32, i32) {
    %c0_i32 = arith.constant 0 : i32
    %c0_i32_0 = arith.constant 0 : i32
    %c0_i32_1 = arith.constant 0 : i32
    return %c0_i32, %c0_i32_0 : i32, i32
  }
  func.func @transform_1(%arg0: i32) -> (i32, i32) {
    %c0_i32 = arith.constant 0 : i32
    %c0_i32_0 = arith.constant 0 : i32
    return %c0_i32, %arg0 : i32, i32
  }
  func.func @transform_2(%arg0: i32) -> (i32, i32) {
    %c0_i32 = arith.constant 0 : i32
    %c0_i32_0 = arith.constant 0 : i32
    %c0_i32_1 = arith.constant 0 : i32
    return %c0_i32, %c0_i32_0 : i32, i32
  }
  func.func @transform_3(%arg0: i32) -> (i32, i32) {
    %c0_i32 = arith.constant 0 : i32
    %c0_i32_0 = arith.constant 0 : i32
    return %c0_i32, %arg0 : i32, i32
  }
}

module attributes {stable_mosaic.version = 11 : i64} {
  func.func @kernel(%arg0: i32, %arg1: memref<16x144xbf16, #tpu.memory_space<vmem>>, %arg2: memref<144x256xbf16, #tpu.memory_space<vmem>>, %arg3: memref<16x1xf32, #tpu.memory_space<vmem>>, %arg4: memref<16x256xf32, #tpu.memory_space<vmem>>, %arg5: memref<16x256xf32, #tpu.memory_space<vmem>>) attributes {dimension_semantics = [#tpu.dimension_semantics<parallel>], iteration_bounds = array<i64: 2>, scalar_prefetch = 0 : i64, scratch_operands = 0 : i64, tpu.core_type = #tpu.core_type<tc>, window_params = [{pipeline_mode = #tpu.pipeline_mode<synchronous>, transform_indices = @transform_0, window_bounds = array<i64: 16, 144>}, {transform_indices = @transform_1, window_bounds = array<i64: 144, 256>}, {pipeline_mode = #tpu.pipeline_mode<synchronous>, transform_indices = @transform_2, window_bounds = array<i64: 16, 1>}, {transform_indices = @transform_3, window_bounds = array<i64: 16, 256>}, {transform_indices = @transform_4, window_bounds = array<i64: 16, 256>}]} {
    %c0 = arith.constant 0 : index
    %c0_0 = arith.constant 0 : index
    %0 = vector.load %arg1[%c0, %c0_0] : memref<16x144xbf16, #tpu.memory_space<vmem>>, vector<16x144xbf16>
    %c0_1 = arith.constant 0 : index
    %c0_2 = arith.constant 0 : index
    %1 = vector.load %arg2[%c0_1, %c0_2] : memref<144x256xbf16, #tpu.memory_space<vmem>>, vector<144x256xbf16>
    %cst = arith.constant dense<0.000000e+00> : vector<16x256xf32>
    %2 = tpu.matmul %0, %1, %cst {dimension_numbers = #tpu.dot_dimension_numbers<[1], [0], [0], [1], [0, 0, 1, 1], [], []>} : vector<16x144xbf16>, vector<144x256xbf16>, vector<16x256xf32> -> vector<16x256xf32>
    %c0_3 = arith.constant 0 : index
    %c0_4 = arith.constant 0 : index
    %3 = vector.load %arg3[%c0_3, %c0_4] : memref<16x1xf32, #tpu.memory_space<vmem>>, vector<16x1xf32>
    %4 = vector.broadcast %3 : vector<16x1xf32> to vector<16x256xf32>
    %5 = arith.addf %2, %4 : vector<16x256xf32>
    %cst_5 = arith.constant 0.000000e+00 : f32
    %6 = vector.broadcast %cst_5 : f32 to vector<16x256xf32>
    %7 = arith.maximumf %5, %6 : vector<16x256xf32>
    %c0_6 = arith.constant 0 : index
    %c0_7 = arith.constant 0 : index
    %8 = vector.load %arg4[%c0_6, %c0_7] : memref<16x256xf32, #tpu.memory_space<vmem>>, vector<16x256xf32>
    %9 = arith.addf %7, %8 : vector<16x256xf32>
    %c0_8 = arith.constant 0 : index
    %c0_9 = arith.constant 0 : index
    %10 = vector.load %arg5[%c0_8, %c0_9] : memref<16x256xf32, #tpu.memory_space<vmem>>, vector<16x256xf32>
    tpu.vector_store %arg5[%c0_8, %c0_9], %9 {strides = array<i32>} : memref<16x256xf32, #tpu.memory_space<vmem>>, vector<16x256xf32>,
    return
  }
  func.func @transform_0(%arg0: i32) -> (i32, i32) {
    %c0_i32 = arith.constant 0 : i32
    %c0_i32_0 = arith.constant 0 : i32
    %c0_i32_1 = arith.constant 0 : i32
    return %c0_i32, %c0_i32_0 : i32, i32
  }
  func.func @transform_1(%arg0: i32) -> (i32, i32) {
    %c0_i32 = arith.constant 0 : i32
    %c0_i32_0 = arith.constant 0 : i32
    return %c0_i32, %arg0 : i32, i32
  }
  func.func @transform_2(%arg0: i32) -> (i32, i32) {
    %c0_i32 = arith.constant 0 : i32
    %c0_i32_0 = arith.constant 0 : i32
    %c0_i32_1 = arith.constant 0 : i32
    return %c0_i32, %c0_i32_0 : i32, i32
  }
  func.func @transform_3(%arg0: i32) -> (i32, i32) {
    %c0_i32 = arith.constant 0 : i32
    %c0_i32_0 = arith.constant 0 : i32
    return %c0_i32, %arg0 : i32, i32
  }
  func.func @transform_4(%arg0: i32) -> (i32, i32) {
    %c0_i32 = arith.constant 0 : i32
    %c0_i32_0 = arith.constant 0 : i32
    return %c0_i32, %arg0 : i32, i32
  }
}

module attributes {stable_mosaic.version = 11 : i64} {
  func.func @kernel(%arg0: i32, %arg1: memref<32x144xbf16, #tpu.memory_space<vmem>>, %arg2: memref<144x256xbf16, #tpu.memory_space<vmem>>, %arg3: memref<32x1xf32, #tpu.memory_space<vmem>>, %arg4: memref<32x256xf32, #tpu.memory_space<vmem>>) attributes {dimension_semantics = [#tpu.dimension_semantics<parallel>], iteration_bounds = array<i64: 2>, scalar_prefetch = 0 : i64, scratch_operands = 0 : i64, tpu.core_type = #tpu.core_type<tc>, window_params = [{pipeline_mode = #tpu.pipeline_mode<synchronous>, transform_indices = @transform_0, window_bounds = array<i64: 32, 144>}, {transform_indices = @transform_1, window_bounds = array<i64: 144, 256>}, {pipeline_mode = #tpu.pipeline_mode<synchronous>, transform_indices = @transform_2, window_bounds = array<i64: 32, 1>}, {transform_indices = @transform_3, window_bounds = array<i64: 32, 256>}]} {
    %c0 = arith.constant 0 : index
    %c0_0 = arith.constant 0 : index
    %0 = vector.load %arg1[%c0, %c0_0] : memref<32x144xbf16, #tpu.memory_space<vmem>>, vector<32x144xbf16>
    %c0_1 = arith.constant 0 : index
    %c0_2 = arith.constant 0 : index
    %1 = vector.load %arg2[%c0_1, %c0_2] : memref<144x256xbf16, #tpu.memory_space<vmem>>, vector<144x256xbf16>
    %cst = arith.constant dense<0.000000e+00> : vector<32x256xf32>
    %2 = tpu.matmul %0, %1, %cst {dimension_numbers = #tpu.dot_dimension_numbers<[1], [0], [0], [1], [0, 0, 1, 1], [], []>} : vector<32x144xbf16>, vector<144x256xbf16>, vector<32x256xf32> -> vector<32x256xf32>
    %c0_3 = arith.constant 0 : index
    %c0_4 = arith.constant 0 : index
    %3 = vector.load %arg3[%c0_3, %c0_4] : memref<32x1xf32, #tpu.memory_space<vmem>>, vector<32x1xf32>
    %4 = vector.broadcast %3 : vector<32x1xf32> to vector<32x256xf32>
    %5 = arith.addf %2, %4 : vector<32x256xf32>
    %cst_5 = arith.constant 0.000000e+00 : f32
    %6 = vector.broadcast %cst_5 : f32 to vector<32x256xf32>
    %7 = arith.maximumf %5, %6 : vector<32x256xf32>
    %c0_6 = arith.constant 0 : index
    %c0_7 = arith.constant 0 : index
    %8 = vector.load %arg4[%c0_6, %c0_7] : memref<32x256xf32, #tpu.memory_space<vmem>>, vector<32x256xf32>
    tpu.vector_store %arg4[%c0_6, %c0_7], %7 {strides = array<i32>} : memref<32x256xf32, #tpu.memory_space<vmem>>, vector<32x256xf32>,
    return
  }
  func.func @transform_0(%arg0: i32) -> (i32, i32) {
    %c0_i32 = arith.constant 0 : i32
    %c0_i32_0 = arith.constant 0 : i32
    %c0_i32_1 = arith.constant 0 : i32
    return %c0_i32, %c0_i32_0 : i32, i32
  }
  func.func @transform_1(%arg0: i32) -> (i32, i32) {
    %c0_i32 = arith.constant 0 : i32
    %c0_i32_0 = arith.constant 0 : i32
    return %c0_i32, %arg0 : i32, i32
  }
  func.func @transform_2(%arg0: i32) -> (i32, i32) {
    %c0_i32 = arith.constant 0 : i32
    %c0_i32_0 = arith.constant 0 : i32
    %c0_i32_1 = arith.constant 0 : i32
    return %c0_i32, %c0_i32_0 : i32, i32
  }
  func.func @transform_3(%arg0: i32) -> (i32, i32) {
    %c0_i32 = arith.constant 0 : i32
    %c0_i32_0 = arith.constant 0 : i32
    return %c0_i32, %arg0 : i32, i32
  }
}

module attributes {stable_mosaic.version = 11 : i64} {
  func.func @kernel(%arg0: i32, %arg1: memref<4x128xbf16, #tpu.memory_space<vmem>>, %arg2: memref<128x256xbf16, #tpu.memory_space<vmem>>, %arg3: memref<4x1xf32, #tpu.memory_space<vmem>>, %arg4: memref<4x256xf32, #tpu.memory_space<vmem>>) attributes {dimension_semantics = [#tpu.dimension_semantics<parallel>], iteration_bounds = array<i64: 2>, scalar_prefetch = 0 : i64, scratch_operands = 0 : i64, tpu.core_type = #tpu.core_type<tc>, window_params = [{pipeline_mode = #tpu.pipeline_mode<synchronous>, transform_indices = @transform_0, window_bounds = array<i64: 4, 128>}, {transform_indices = @transform_1, window_bounds = array<i64: 128, 256>}, {pipeline_mode = #tpu.pipeline_mode<synchronous>, transform_indices = @transform_2, window_bounds = array<i64: 4, 1>}, {transform_indices = @transform_3, window_bounds = array<i64: 4, 256>}]} {
    %c0 = arith.constant 0 : index
    %c0_0 = arith.constant 0 : index
    %0 = vector.load %arg1[%c0, %c0_0] : memref<4x128xbf16, #tpu.memory_space<vmem>>, vector<4x128xbf16>
    %c0_1 = arith.constant 0 : index
    %c0_2 = arith.constant 0 : index
    %1 = vector.load %arg2[%c0_1, %c0_2] : memref<128x256xbf16, #tpu.memory_space<vmem>>, vector<128x256xbf16>
    %cst = arith.constant dense<0.000000e+00> : vector<4x256xf32>
    %2 = tpu.matmul %0, %1, %cst {dimension_numbers = #tpu.dot_dimension_numbers<[1], [0], [0], [1], [0, 0, 1, 1], [], []>} : vector<4x128xbf16>, vector<128x256xbf16>, vector<4x256xf32> -> vector<4x256xf32>
    %c0_3 = arith.constant 0 : index
    %c0_4 = arith.constant 0 : index
    %3 = vector.load %arg3[%c0_3, %c0_4] : memref<4x1xf32, #tpu.memory_space<vmem>>, vector<4x1xf32>
    %4 = vector.broadcast %3 : vector<4x1xf32> to vector<4x256xf32>
    %5 = arith.addf %2, %4 : vector<4x256xf32>
    %cst_5 = arith.constant 0.000000e+00 : f32
    %6 = vector.broadcast %cst_5 : f32 to vector<4x256xf32>
    %7 = arith.maximumf %5, %6 : vector<4x256xf32>
    %c0_6 = arith.constant 0 : index
    %c0_7 = arith.constant 0 : index
    %8 = vector.load %arg4[%c0_6, %c0_7] : memref<4x256xf32, #tpu.memory_space<vmem>>, vector<4x256xf32>
    tpu.vector_store %arg4[%c0_6, %c0_7], %7 {strides = array<i32>} : memref<4x256xf32, #tpu.memory_space<vmem>>, vector<4x256xf32>,
    return
  }
  func.func @transform_0(%arg0: i32) -> (i32, i32) {
    %c0_i32 = arith.constant 0 : i32
    %c0_i32_0 = arith.constant 0 : i32
    %c0_i32_1 = arith.constant 0 : i32
    return %c0_i32, %c0_i32_0 : i32, i32
  }
  func.func @transform_1(%arg0: i32) -> (i32, i32) {
    %c0_i32 = arith.constant 0 : i32
    %c0_i32_0 = arith.constant 0 : i32
    return %c0_i32, %arg0 : i32, i32
  }
  func.func @transform_2(%arg0: i32) -> (i32, i32) {
    %c0_i32 = arith.constant 0 : i32
    %c0_i32_0 = arith.constant 0 : i32
    %c0_i32_1 = arith.constant 0 : i32
    return %c0_i32, %c0_i32_0 : i32, i32
  }
  func.func @transform_3(%arg0: i32) -> (i32, i32) {
    %c0_i32 = arith.constant 0 : i32
    %c0_i32_0 = arith.constant 0 : i32
    return %c0_i32, %arg0 : i32, i32
  }
}

module attributes {stable_mosaic.version = 11 : i64} {
  func.func @kernel(%arg0: i32, %arg1: memref<12x36xbf16, #tpu.memory_space<vmem>>, %arg2: memref<36x256xbf16, #tpu.memory_space<vmem>>, %arg3: memref<12x1xf32, #tpu.memory_space<vmem>>, %arg4: memref<12x256xf32, #tpu.memory_space<vmem>>) attributes {dimension_semantics = [#tpu.dimension_semantics<parallel>], iteration_bounds = array<i64: 2>, scalar_prefetch = 0 : i64, scratch_operands = 0 : i64, tpu.core_type = #tpu.core_type<tc>, window_params = [{pipeline_mode = #tpu.pipeline_mode<synchronous>, transform_indices = @transform_0, window_bounds = array<i64: 12, 36>}, {transform_indices = @transform_1, window_bounds = array<i64: 36, 256>}, {pipeline_mode = #tpu.pipeline_mode<synchronous>, transform_indices = @transform_2, window_bounds = array<i64: 12, 1>}, {transform_indices = @transform_3, window_bounds = array<i64: 12, 256>}]} {
    %c0 = arith.constant 0 : index
    %c0_0 = arith.constant 0 : index
    %0 = vector.load %arg1[%c0, %c0_0] : memref<12x36xbf16, #tpu.memory_space<vmem>>, vector<12x36xbf16>
    %c0_1 = arith.constant 0 : index
    %c0_2 = arith.constant 0 : index
    %1 = vector.load %arg2[%c0_1, %c0_2] : memref<36x256xbf16, #tpu.memory_space<vmem>>, vector<36x256xbf16>
    %cst = arith.constant dense<0.000000e+00> : vector<12x256xf32>
    %2 = tpu.matmul %0, %1, %cst {dimension_numbers = #tpu.dot_dimension_numbers<[1], [0], [0], [1], [0, 0, 1, 1], [], []>} : vector<12x36xbf16>, vector<36x256xbf16>, vector<12x256xf32> -> vector<12x256xf32>
    %c0_3 = arith.constant 0 : index
    %c0_4 = arith.constant 0 : index
    %3 = vector.load %arg3[%c0_3, %c0_4] : memref<12x1xf32, #tpu.memory_space<vmem>>, vector<12x1xf32>
    %4 = vector.broadcast %3 : vector<12x1xf32> to vector<12x256xf32>
    %5 = arith.addf %2, %4 : vector<12x256xf32>
    %cst_5 = arith.constant 0.000000e+00 : f32
    %6 = vector.broadcast %cst_5 : f32 to vector<12x256xf32>
    %7 = arith.maximumf %5, %6 : vector<12x256xf32>
    %c0_6 = arith.constant 0 : index
    %c0_7 = arith.constant 0 : index
    %8 = vector.load %arg4[%c0_6, %c0_7] : memref<12x256xf32, #tpu.memory_space<vmem>>, vector<12x256xf32>
    tpu.vector_store %arg4[%c0_6, %c0_7], %7 {strides = array<i32>} : memref<12x256xf32, #tpu.memory_space<vmem>>, vector<12x256xf32>,
    return
  }
  func.func @transform_0(%arg0: i32) -> (i32, i32) {
    %c0_i32 = arith.constant 0 : i32
    %c0_i32_0 = arith.constant 0 : i32
    %c0_i32_1 = arith.constant 0 : i32
    return %c0_i32, %c0_i32_0 : i32, i32
  }
  func.func @transform_1(%arg0: i32) -> (i32, i32) {
    %c0_i32 = arith.constant 0 : i32
    %c0_i32_0 = arith.constant 0 : i32
    return %c0_i32, %arg0 : i32, i32
  }
  func.func @transform_2(%arg0: i32) -> (i32, i32) {
    %c0_i32 = arith.constant 0 : i32
    %c0_i32_0 = arith.constant 0 : i32
    %c0_i32_1 = arith.constant 0 : i32
    return %c0_i32, %c0_i32_0 : i32, i32
  }
  func.func @transform_3(%arg0: i32) -> (i32, i32) {
    %c0_i32 = arith.constant 0 : i32
    %c0_i32_0 = arith.constant 0 : i32
    return %c0_i32, %arg0 : i32, i32
  }
}

module attributes {stable_mosaic.version = 11 : i64} {
  func.func @kernel(%arg0: i32, %arg1: memref<3x3xbf16, #tpu.memory_space<vmem>>, %arg2: memref<3x1024xbf16, #tpu.memory_space<vmem>>, %arg3: memref<3x1xf32, #tpu.memory_space<vmem>>, %arg4: memref<3x1024xf32, #tpu.memory_space<vmem>>) attributes {dimension_semantics = [#tpu.dimension_semantics<parallel>], iteration_bounds = array<i64: 2>, scalar_prefetch = 0 : i64, scratch_operands = 0 : i64, tpu.core_type = #tpu.core_type<tc>, window_params = [{pipeline_mode = #tpu.pipeline_mode<synchronous>, transform_indices = @transform_0, window_bounds = array<i64: 3, 3>}, {transform_indices = @transform_1, window_bounds = array<i64: 3, 1024>}, {pipeline_mode = #tpu.pipeline_mode<synchronous>, transform_indices = @transform_2, window_bounds = array<i64: 3, 1>}, {transform_indices = @transform_3, window_bounds = array<i64: 3, 1024>}]} {
    %c0 = arith.constant 0 : index
    %c0_0 = arith.constant 0 : index
    %0 = vector.load %arg1[%c0, %c0_0] : memref<3x3xbf16, #tpu.memory_space<vmem>>, vector<3x3xbf16>
    %c0_1 = arith.constant 0 : index
    %c0_2 = arith.constant 0 : index
    %1 = vector.load %arg2[%c0_1, %c0_2] : memref<3x1024xbf16, #tpu.memory_space<vmem>>, vector<3x1024xbf16>
    %cst = arith.constant dense<0.000000e+00> : vector<3x1024xf32>
    %2 = tpu.matmul %0, %1, %cst {dimension_numbers = #tpu.dot_dimension_numbers<[1], [0], [0], [1], [0, 0, 1, 1], [], []>} : vector<3x3xbf16>, vector<3x1024xbf16>, vector<3x1024xf32> -> vector<3x1024xf32>
    %c0_3 = arith.constant 0 : index
    %c0_4 = arith.constant 0 : index
    %3 = vector.load %arg3[%c0_3, %c0_4] : memref<3x1xf32, #tpu.memory_space<vmem>>, vector<3x1xf32>
    %4 = vector.broadcast %3 : vector<3x1xf32> to vector<3x1024xf32>
    %5 = arith.addf %2, %4 : vector<3x1024xf32>
    %6 = math.tanh %5 : vector<3x1024xf32>
    %c0_5 = arith.constant 0 : index
    %c0_6 = arith.constant 0 : index
    %7 = vector.load %arg4[%c0_5, %c0_6] : memref<3x1024xf32, #tpu.memory_space<vmem>>, vector<3x1024xf32>
    tpu.vector_store %arg4[%c0_5, %c0_6], %6 {strides = array<i32>} : memref<3x1024xf32, #tpu.memory_space<vmem>>, vector<3x1024xf32>,
    return
  }
  func.func @transform_0(%arg0: i32) -> (i32, i32) {
    %c0_i32 = arith.constant 0 : i32
    %c0_i32_0 = arith.constant 0 : i32
    %c0_i32_1 = arith.constant 0 : i32
    return %c0_i32, %c0_i32_0 : i32, i32
  }
  func.func @transform_1(%arg0: i32) -> (i32, i32) {
    %c0_i32 = arith.constant 0 : i32
    %c0_i32_0 = arith.constant 0 : i32
    return %c0_i32, %arg0 : i32, i32
  }
  func.func @transform_2(%arg0: i32) -> (i32, i32) {
    %c0_i32 = arith.constant 0 : i32
    %c0_i32_0 = arith.constant 0 : i32
    %c0_i32_1 = arith.constant 0 : i32
    return %c0_i32, %c0_i32_0 : i32, i32
  }
  func.func @transform_3(%arg0: i32) -> (i32, i32) {
    %c0_i32 = arith.constant 0 : i32
    %c0_i32_0 = arith.constant 0 : i32
    return %c0_i32, %arg0 : i32, i32
  }
}

</mosaic_0001>

<bundles_post_ra>
// kernel: generator_forward.14
= control target key start
LH: loop header
LB: loop body
LE: loop exit
PB: predicated region body
PF: predicated region fallthrough
CT: control target
= control target key end

     0   :  { %v130_v1 = vmov 0   ;;  %vm72_vm0 = vcmask 1040384   ;;  %vm65_vm1 = vcmask 146432   ;;  %vm99_vm2 = vcmask 261120   ;;  %s187_s1 = inlined_call_operand.vmem [shape: bf16[18,32], index: 1, kind: input, shape index: {}]   ;;  %s188_s2 = inlined_call_operand.vmem [shape: f32[32,1], index: 2, kind: input, shape index: {}]   ;;  %s189_s0 = inlined_call_operand.vmem [shape: bf16[32,18], index: 0, kind: input, shape index: {}]   ;;  %s190_s3 = inlined_call_operand.vmem [shape: f32[32,32], index: 3, kind: output, shape index: {}]  }
   0x1   :  { %v21_v0 = vld [vmem:[%s187_s1 + $0x8] sm:$0x1]  ;;  %129 = vset.pattern.permute.xlu1 %v130_v1  ;;  %128 = vset.pattern.permute.xlu0 %v130_v1  ;;  %v24_v3 = vld [vmem:[%s188_s2 + $0x10] sm:$0xff]  ;;  %v22_v4 = vld [vmem:[%s188_s2] sm:$0xff] }
   0x2   :  { %v61_v2 = vunpack.c.l.b16 %v21_v0  ;;  %38 = vperm.xlu1 %129, %v24_v3   ;;  %28 = vperm.xlu0 %128, %v22_v4   ;;  %v124_v7 = vld [vmem:[%s187_s1] sm:$0xff]  ;;  %v25_v8 = vld [vmem:[%s188_s2 + $0x18] sm:$0xff]  ;;  %v23_v9 = vld [vmem:[%s188_s2 + $0x8] sm:$0xff] }
   0x3   :  { %v122_v10 = vld [vmem:[%s189_s0] sm:$0xff]  ;;  %v123_v11 = vld [vmem:[%s189_s0 + $0x8] sm:$0xff] }
   0x4   :  { %v63_v5 = vpack.c.b16 %v61_v2, %v61_v2 }
   0x6   :  { %v74_v6 = vsel %vm72_vm0, %v63_v5, 0 }
   0x7   :  { %82 = vmatpush.bf16.msra.mxu0 %v74_v6  ;;  %125 = vmatpush.bf16.msra.mxu1 %v74_v6 }
   0xa   :  { %43 = vperm.xlu1 %129, %v25_v8   ;;  %33 = vperm.xlu0 %128, %v23_v9  }
   0xb   :  { %83 = vmatpush.bf16.msra.mxu0 %v124_v7  ;;  %126 = vmatpush.bf16.msra.mxu1 %v124_v7 }
   0xe   :  { %120 = vmatmul.msk.bf16.vlgmr.msra.gmra.mxu0 %vm65_vm1, %v122_v10  ;;  %121 = vmatmul.msk.bf16.vlgmr.msra.gmra.mxu1 %vm65_vm1, %v123_v11 }
  0x74   :  { %v39_v12 = vpop.permute.xlu1 %38  ;;  %v29_v13 = vpop.permute.xlu0 %28 }
  0x7c   :  { %v44_v20 = vpop.permute.xlu1 %43  ;;  %v34_v21 = vpop.permute.xlu0 %33 }
  0x8b   :  { %v85_v14 = vpop.f32.mrf.mxu0  ;;  %v90_v15 = vpop.f32.mrf.mxu1 }
  0x8c   :  { %v86_v16 = vadd.f32 %v85_v14, %v29_v13  ;;  %v91_v17 = vadd.f32 %v90_v15, %v39_v12 }
  0x8e   :  { %v95_v18 = vmax.f32 %v86_v16, 0.0  ;;  %v97_v19 = vmax.f32 %v91_v17, 0.0 }
  0x90   :  { %100 = vst.msk [vmem:[%s190_s3] sm:$0xff] %vm99_vm2, %v95_v18 }
  0x91   :  { %102 = vst.msk [vmem:[%s190_s3 + $0x10] sm:$0xff] %vm99_vm2, %v97_v19 }
  0x93   :  { %v87_v22 = vpop.f32.mrf.mxu0  ;;  %v92_v23 = vpop.f32.mrf.mxu1 }
  0x94   :  { %v88_v24 = vadd.f32 %v87_v22, %v34_v21  ;;  %v93_v25 = vadd.f32 %v92_v23, %v44_v20 }
  0x96   :  { %v96_v26 = vmax.f32 %v88_v24, 0.0  ;;  %v98_v27 = vmax.f32 %v93_v25, 0.0 }
  0x98   :  { %101 = vst.msk [vmem:[%s190_s3 + $0x8] sm:$0xff] %vm99_vm2, %v96_v26 }
  0x99   :  { %103 = vst.msk [vmem:[%s190_s3 + $0x18] sm:$0xff] %vm99_vm2, %v98_v27 }

// kernel: generator_forward.15
= control target key start
LH: loop header
LB: loop body
LE: loop exit
PB: predicated region body
PF: predicated region fallthrough
CT: control target
= control target key end

     0   :  { %v113_v1 = vmov 0   ;;  %vm65_vm0 = vcmask 1043456   ;;  %vm61_vm1 = vcmask 588800   ;;  %s166_s1 = inlined_call_operand.vmem [shape: bf16[72,128], index: 1, kind: input, shape index: {}]   ;;  %s167_s2 = inlined_call_operand.vmem [shape: f32[8,1], index: 2, kind: input, shape index: {}]   ;;  %s168_s0 = inlined_call_operand.vmem [shape: bf16[8,72], index: 0, kind: input, shape index: {}]   ;;  %s169_s3 = inlined_call_operand.vmem [shape: f32[8,128], index: 3, kind: input, shape index: {}]   ;;  %s170_s4 = inlined_call_operand.vmem [shape: f32[8,128], index: 4, kind: output, shape index: {}]  }
   0x1   :  { %v27_v0 = vld [vmem:[%s166_s1 + $0x20] sm:$0xf]  ;;  %112 = vset.pattern.permute.xlu0 %v113_v1  ;;  %v110_v6 = vld [vmem:[%s166_s1 + $0x18] sm:$0xff]  ;;  %v109_v7 = vld [vmem:[%s166_s1 + $0x10] sm:$0xff] }
   0x2   :  { %v51_v2 = vunpack.c.l.b16 %v27_v0  ;;  %v28_v3 = vld [vmem:[%s167_s2] sm:$0xff]  ;;  %v108_v8 = vld [vmem:[%s166_s1 + $0x8] sm:$0xff] }
   0x3   :  { %31 = vperm.xlu0 %112, %v28_v3   ;;  %v107_v9 = vld [vmem:[%s166_s1] sm:$0xff] }
   0x4   :  { %v56_v4 = vpack.c.b16 %v51_v2, %v51_v2  ;;  %v18_v10 = vld [vmem:[%s168_s0] sm:$0xf] }
   0x5   :  { %v83_v14 = vld [vmem:[%s169_s3] sm:$0xff] }
   0x6   :  { %v67_v5 = vsel %vm65_vm0, %v56_v4, 0 }
   0x7   :  { %72 = vmatpush.bf16.msra.mxu0 %v67_v5 }
   0xb   :  { %73 = vmatpush.bf16.msra.mxu0 %v110_v6 }
   0xf   :  { %74 = vmatpush.bf16.msra.mxu0 %v109_v7 }
  0x13   :  { %75 = vmatpush.bf16.msra.mxu0 %v108_v8 }
  0x17   :  { %76 = vmatpush.bf16.msra.mxu0 %v107_v9 }
  0x1a   :  { %106 = vmatmul.msk.bf16.vlgmr.msra.gmra.mxu0 %vm61_vm1, %v18_v10 }
  0x75   :  { %v32_v11 = vpop.permute.xlu0 %31 }
  0x97   :  { %v78_v12 = vpop.f32.mrf.mxu0 }
  0x98   :  { %v79_v13 = vadd.f32 %v78_v12, %v32_v11 }
  0x9a   :  { %v82_v15 = vmax.f32 %v79_v13, 0.0 }
  0x9c   :  { %v84_v16 = vadd.f32 %v83_v14, %v82_v15 }
  0x9e   :  { %85 = vst [vmem:[%s170_s4] sm:$0xff] %v84_v16 }
  0x9f   :  { %v80_v17 = vpop.f32.mrf.mxu0 }

// kernel: generator_forward.19
= control target key start
LH: loop header
LB: loop body
LE: loop exit
PB: predicated region body
PF: predicated region fallthrough
CT: control target
= control target key end

     0   :  { %v256_v1 = vmov 0   ;;  %vm140_vm0 = vcmask 1043456   ;;  %vm127_vm1 = vcmask 588800   ;;  %s352_s1 = inlined_call_operand.vmem [shape: bf16[72,128], index: 1, kind: input, shape index: {}]   ;;  %s353_s2 = inlined_call_operand.vmem [shape: f32[64,1], index: 2, kind: input, shape index: {}]   ;;  %s354_s0 = inlined_call_operand.vmem [shape: bf16[64,72], index: 0, kind: input, shape index: {}]   ;;  %s355_s3 = inlined_call_operand.vmem [shape: f32[64,128], index: 3, kind: output, shape index: {}]  }
   0x1   :  { %v31_v0 = vld [vmem:[%s352_s1 + $0x20] sm:$0xf]  ;;  %254 = vset.pattern.permute.xlu1 %v256_v1  ;;  %253 = vset.pattern.permute.xlu0 %v256_v1  ;;  %v34_v3 = vld [vmem:[%s353_s2 + $0x10] sm:$0xff]  ;;  %v236_v8 = vld [vmem:[%s352_s1 + $0x18] sm:$0xff] }
   0x2   :  { %v117_v2 = vunpack.c.l.b16 %v31_v0  ;;  %v32_v4 = vld [vmem:[%s353_s2] sm:$0xff]  ;;  %255 = vset.pattern.permute.xlu2 %v256_v1  ;;  %52 = vperm.xlu1 %254, %v34_v3   ;;  %v35_v9 = vld [vmem:[%s353_s2 + $0x18] sm:$0xff]  ;;  %v33_v10 = vld [vmem:[%s353_s2 + $0x8] sm:$0xff] }
   0x3   :  { %42 = vperm.xlu0 %253, %v32_v4   ;;  %v36_v7 = vld [vmem:[%s353_s2 + $0x20] sm:$0xff]  ;;  %v235_v11 = vld [vmem:[%s352_s1 + $0x10] sm:$0xff]  ;;  %v37_v12 = vld [vmem:[%s353_s2 + $0x28] sm:$0xff] }
   0x4   :  { %v122_v5 = vpack.c.b16 %v117_v2, %v117_v2  ;;  %62 = vperm.xlu2 %255, %v36_v7   ;;  %v234_v13 = vld [vmem:[%s352_s1 + $0x8] sm:$0xff]  ;;  %v39_v14 = vld [vmem:[%s353_s2 + $0x38] sm:$0xff]  ;;  %v38_v15 = vld [vmem:[%s353_s2 + $0x30] sm:$0xff] }
   0x5   :  { %v233_v16 = vld [vmem:[%s352_s1] sm:$0xff]  ;;  %v230_v18 = vld [vmem:[%s354_s0 + $0x8] sm:$0xff]  ;;  %v231_v19 = vld [vmem:[%s354_s0 + $0x10] sm:$0xff] }
   0x6   :  { %v142_v6 = vsel %vm140_vm0, %v122_v5, 0  ;;  %v229_v17 = vld [vmem:[%s354_s0] sm:$0xff]  ;;  %v232_v20 = vld [vmem:[%s354_s0 + $0x18] sm:$0xff] }
   0x7   :  { %147 = vmatpush.bf16.msra.mxu0 %v142_v6  ;;  %237 = vmatpush.bf16.msra.mxu1 %v142_v6 }
   0x8   :  { %238 = vmatpush.bf16.msra.mxu2 %v142_v6  ;;  %239 = vmatpush.bf16.msra.mxu3 %v142_v6 }
   0xa   :  { %57 = vperm.xlu1 %254, %v35_v9  }
   0xb   :  { %148 = vmatpush.bf16.msra.mxu0 %v236_v8  ;;  %240 = vmatpush.bf16.msra.mxu1 %v236_v8 }
   0xc   :  { %241 = vmatpush.bf16.msra.mxu2 %v236_v8  ;;  %242 = vmatpush.bf16.msra.mxu3 %v236_v8 }
   0xd   :  { %47 = vperm.xlu0 %253, %v33_v10   ;;  %67 = vperm.xlu2 %255, %v37_v12  }
   0xf   :  { %149 = vmatpush.bf16.msra.mxu0 %v235_v11  ;;  %243 = vmatpush.bf16.msra.mxu1 %v235_v11 }
  0x10   :  { %244 = vmatpush.bf16.msra.mxu2 %v235_v11  ;;  %245 = vmatpush.bf16.msra.mxu3 %v235_v11 }
  0x12   :  { %77 = vperm.xlu1 %254, %v39_v14  }
  0x13   :  { %150 = vmatpush.bf16.msra.mxu0 %v234_v13  ;;  %246 = vmatpush.bf16.msra.mxu1 %v234_v13 }
  0x14   :  { %247 = vmatpush.bf16.msra.mxu2 %v234_v13  ;;  %248 = vmatpush.bf16.msra.mxu3 %v234_v13 }
  0x15   :  { %72 = vperm.xlu0 %253, %v38_v15  }
  0x17   :  { %151 = vmatpush.bf16.msra.mxu0 %v233_v16  ;;  %249 = vmatpush.bf16.msra.mxu1 %v233_v16 }
  0x18   :  { %250 = vmatpush.bf16.msra.mxu2 %v233_v16  ;;  %251 = vmatpush.bf16.msra.mxu3 %v233_v16 }
  0x1a   :  { %225 = vmatmul.msk.bf16.vlgmr.msra.gmra.mxu0 %vm127_vm1, %v229_v17  ;;  %226 = vmatmul.msk.bf16.vlgmr.msra.gmra.mxu1 %vm127_vm1, %v230_v18 }
  0x1b   :  { %227 = vmatmul.msk.bf16.vlgmr.msra.gmra.mxu2 %vm127_vm1, %v231_v19  ;;  %228 = vmatmul.msk.bf16.vlgmr.msra.gmra.mxu3 %vm127_vm1, %v232_v20 }
  0x5e   :  { %v63_v31 = vpop.permute.xlu2 %62 }
  0x67   :  { %v68_v46 = vpop.permute.xlu2 %67 }
  0x74   :  { %v53_v22 = vpop.permute.xlu1 %52 }
  0x75   :  { %v43_v21 = vpop.permute.xlu0 %42 }
  0x7c   :  { %v58_v30 = vpop.permute.xlu1 %57 }
  0x7f   :  { %v48_v23 = vpop.permute.xlu0 %47 }
  0x84   :  { %v78_v45 = vpop.permute.xlu1 %77 }
  0x87   :  { %v73_v32 = vpop.permute.xlu0 %72 }
  0x97   :  { %v153_v24 = vpop.f32.mrf.mxu0  ;;  %v158_v25 = vpop.f32.mrf.mxu1 }
  0x98   :  { %v154_v26 = vadd.f32 %v153_v24, %v43_v21  ;;  %v159_v27 = vadd.f32 %v158_v25, %v53_v22 }
  0x9a   :  { %v173_v28 = vmax.f32 %v154_v26, 0.0  ;;  %v175_v29 = vmax.f32 %v159_v27, 0.0 }
  0x9c   :  { %181 = vst [vmem:[%s355_s3] sm:$0xff] %v173_v28 }
  0x9d   :  { %183 = vst [vmem:[%s355_s3 + $0x10] sm:$0xff] %v175_v29 }
  0x9e   :  { %v163_v33 = vpop.f32.mrf.mxu2  ;;  %v168_v34 = vpop.f32.mrf.mxu3 }
  0x9f   :  { %v164_v35 = vadd.f32 %v163_v33, %v63_v31  ;;  %v169_v36 = vadd.f32 %v168_v34, %v73_v32  ;;  %v155_v37 = vpop.f32.mrf.mxu0  ;;  %v160_v38 = vpop.f32.mrf.mxu1 }
  0xa0   :  { %v156_v39 = vadd.f32 %v155_v37, %v48_v23  ;;  %v161_v40 = vadd.f32 %v160_v38, %v58_v30 }
  0xa1   :  { %v177_v41 = vmax.f32 %v164_v35, 0.0  ;;  %v179_v42 = vmax.f32 %v169_v36, 0.0 }
  0xa2   :  { %v174_v43 = vmax.f32 %v156_v39, 0.0  ;;  %v176_v44 = vmax.f32 %v161_v40, 0.0 }
  0xa3   :  { %185 = vst [vmem:[%s355_s3 + $0x20] sm:$0xff] %v177_v41 }
  0xa4   :  { %187 = vst [vmem:[%s355_s3 + $0x30] sm:$0xff] %v179_v42 }
  0xa5   :  { %182 = vst [vmem:[%s355_s3 + $0x8] sm:$0xff] %v174_v43 }
  0xa6   :  { %184 = vst [vmem:[%s355_s3 + $0x18] sm:$0xff] %v176_v44  ;;  %v165_v47 = vpop.f32.mrf.mxu2  ;;  %v170_v48 = vpop.f32.mrf.mxu3 }
  0xa7   :  { %v166_v49 = vadd.f32 %v165_v47, %v68_v46  ;;  %v171_v50 = vadd.f32 %v170_v48, %v78_v45 }
  0xa9   :  { %v178_v51 = vmax.f32 %v166_v49, 0.0  ;;  %v180_v52 = vmax.f32 %v171_v50, 0.0 }
  0xab   :  { %186 = vst [vmem:[%s355_s3 + $0x28] sm:$0xff] %v178_v51 }
  0xac   :  { %188 = vst [vmem:[%s355_s3 + $0x38] sm:$0xff] %v180_v52 }

// kernel: generator_forward.20
= control target key start
LH: loop header
LB: loop body
LE: loop exit
PB: predicated region body
PF: predicated region fallthrough
CT: control target
= control target key end

     0   :  { %s860_s15 = smov 0   ;;  %s862_s16 = smov 0   ;;  %s1035_s0 = inlined_call_operand.vmem [shape: bf16[16,144], index: 0, kind: input, shape index: {}]   ;;  %s1036_s1 = inlined_call_operand.vmem [shape: bf16[144,512], index: 1, kind: input, shape index: {}]   ;;  %s1037_s2 = inlined_call_operand.vmem [shape: f32[16,1], index: 2, kind: input, shape index: {}]   ;;  %s1038_s3 = inlined_call_operand.vmem [shape: f32[16,512], index: 3, kind: input, shape index: {}]   ;;  %s1039_s4 = inlined_call_operand.vmem [shape: f32[16,512], index: 4, kind: output, shape index: {}]  }
   0x1   :  { %s864_s17 = smov 0  }
   0x2 LB: > { %s660_s18 = sadd.s32 4294967295, %s832_s17   ;;  %s877_s19 = sadd.s32 1, %s832_s17   ;;  %s832_s17 = sphi %s864_s17, %s1044_s17   ;;  %s828_s16 = sphi %s862_s16, %s1043_s16   ;;  %s824_s15 = sphi %s860_s15, %s1042_s15  }
   0x3   : > { %s39_s20 = ssub.s32 %s832_s17, %s877_s19  ;;  %s42_s21 = sadd.s32 1, %s828_s16 }
   0x4   : > { %p40_p0 = scmp.eq.s32.totalorder %s39_s20, 0  ;;  %p49_p1 = scmp.ne.s32.totalorder %s828_s16, %s824_s15 }
   0x5   : > { %p50_p2 = scmp.eq.s32.totalorder %s832_s17, 0  ;;  %p126_p3 = scmp.eq.s32.totalorder %s660_s18, 1 }
   0x6   : > { %s888_s22 = scalar_select %p40_p0, %s828_s16, %s42_s21  }
   0x7   : > { %p890_p4 = por %p50_p2, %p49_p1  ;;  %p894_p5 = por %p126_p3, %p49_p1 }
   0x8   : > { %p663_p6 = scmp.ge.s32.totalorder %s832_s17, 2 }
   0xa   : > { %154 = sbr.rel (%p663_p6) target bundleno = 45 (0x2d), region = 24 }
   0xf   : > { %157 = sbr.rel (!%p890_p4) target bundleno = 37 (0x25), region = 28  ;;  %s159_s25 = sand.u32 (%p890_p4), 1, %s828_s16  }
  0x10   : > { %s759_s26 = sshll.u32 (%p890_p4), %s832_s17, 3  ;;  %s782_s27 = smul.u32 (%p890_p4), 144, %s159_s25 }
  0x11   : > { %s906_s30 = scalar_lea.vmem (%p890_p4), %s1036_s1, %s759_s26 }
  0x12   : > { %v227_v0 = vld [vmem:[%s906_s30] sm:$0xff] (%p890_p4)  ;;  %v229_v1 = vld [vmem:[%s906_s30 + $0x10] sm:$0xff] (%p890_p4)  ;;  %s911_s5 = scalar_lea.vmem (%p890_p4), [#allocation2], %s782_s27 }
  0x13   : > { %v231_v2 = vld [vmem:[%s906_s30 + $0x20] sm:$0xff] (%p890_p4)  ;;  %228 = vst [vmem:[%s911_s5] sm:$0xff] (%p890_p4), %v227_v0  ;;  %v233_v3 = vld [vmem:[%s906_s30 + $0x30] sm:$0xff] (%p890_p4) }
  0x14   : > { %230 = vst [vmem:[%s911_s5 + $0x8] sm:$0xff] %v229_v1  ;;  %v235_v4 = vld [vmem:[%s906_s30 + $0x40] sm:$0xff]  ;;  %v237_v5 = vld [vmem:[%s906_s30 + $0x50] sm:$0xff] }
  0x15   : > { %232 = vst [vmem:[%s911_s5 + $0x10] sm:$0xff] %v231_v2  ;;  %v239_v6 = vld [vmem:[%s906_s30 + $0x60] sm:$0xff]  ;;  %v241_v7 = vld [vmem:[%s906_s30 + $0x70] sm:$0xff] }
  0x16   : > { %234 = vst [vmem:[%s911_s5 + $0x18] sm:$0xff] %v233_v3  ;;  %v243_v8 = vld [vmem:[%s906_s30 + $0x80] sm:$0xff]  ;;  %v245_v9 = vld [vmem:[%s906_s30 + $0x90] sm:$0xff] }
  0x17   : > { %236 = vst [vmem:[%s911_s5 + $0x20] sm:$0xff] %v235_v4  ;;  %v247_v10 = vld [vmem:[%s906_s30 + $0xa0] sm:$0xff]  ;;  %v249_v11 = vld [vmem:[%s906_s30 + $0xb0] sm:$0xff] }
  0x18   : > { %238 = vst [vmem:[%s911_s5 + $0x28] sm:$0xff] %v237_v5  ;;  %v251_v12 = vld [vmem:[%s906_s30 + $0xc0] sm:$0xff]  ;;  %v253_v13 = vld [vmem:[%s906_s30 + $0xd0] sm:$0xff] }
  0x19   : > { %240 = vst [vmem:[%s911_s5 + $0x30] sm:$0xff] %v239_v6  ;;  %v255_v14 = vld [vmem:[%s906_s30 + $0xe0] sm:$0xff]  ;;  %v257_v15 = vld [vmem:[%s906_s30 + $0xf0] sm:$0xff] }
  0x1a   : > { %242 = vst [vmem:[%s911_s5 + $0x38] sm:$0xff] %v241_v7  ;;  %v259_v16 = vld [vmem:[%s906_s30 + $0x100] sm:$0xff]  ;;  %v261_v17 = vld [vmem:[%s906_s30 + $0x110] sm:$0xff] }
  0x1b   : > { %244 = vst [vmem:[%s911_s5 + $0x40] sm:$0xff] %v243_v8 }
  0x1c   : > { %246 = vst [vmem:[%s911_s5 + $0x48] sm:$0xff] %v245_v9 }
  0x1d   : > { %248 = vst [vmem:[%s911_s5 + $0x50] sm:$0xff] %v247_v10 }
  0x1e   : > { %250 = vst [vmem:[%s911_s5 + $0x58] sm:$0xff] %v249_v11 }
  0x1f   : > { %252 = vst [vmem:[%s911_s5 + $0x60] sm:$0xff] %v251_v12 }
  0x20   : > { %254 = vst [vmem:[%s911_s5 + $0x68] sm:$0xff] %v253_v13 }
  0x21   : > { %256 = vst [vmem:[%s911_s5 + $0x70] sm:$0xff] %v255_v14 }
  0x22   : > { %258 = vst [vmem:[%s911_s5 + $0x78] sm:$0xff] %v257_v15 }
  0x23   : > { %260 = vst [vmem:[%s911_s5 + $0x80] sm:$0xff] %v259_v16 }
  0x24   : > { %262 = vst [vmem:[%s911_s5 + $0x88] sm:$0xff] %v261_v17 }
  0x25 PF: > { %268 = sbr.rel (!%p890_p4) target bundleno = 45 (0x2d), region = 66  ;;  %s270_s6 = sand.u32 (%p890_p4), 1, %s828_s16  }
  0x26   : > { %s760_s7 = sshll.u32 (%p890_p4), %s832_s17, 4  ;;  %s666_s8 = sshll.u32 (%p890_p4), %s270_s6, 5 }
  0x27   : > { %s275_s11 = scalar_lea.vmem (%p890_p4), %s1038_s3, %s760_s7  ;;  %s272_s12 = scalar_lea.vmem (%p890_p4), [#allocation3], %s666_s8 }
  0x28   : > { %v288_v18 = vld [vmem:[%s275_s11] sm:$0xff] (%p890_p4)  ;;  %v290_v19 = vld [vmem:[%s275_s11 + $0x8] sm:$0xff] (%p890_p4) }
  0x29   : > { %v292_v20 = vld [vmem:[%s275_s11 + $0x20] sm:$0xff] (%p890_p4)  ;;  %289 = vst [vmem:[%s272_s12] sm:$0xff] (%p890_p4), %v288_v18  ;;  %v294_v21 = vld [vmem:[%s275_s11 + $0x28] sm:$0xff] (%p890_p4) }
  0x2a   : > { %291 = vst [vmem:[%s272_s12 + $0x8] sm:$0xff] %v290_v19 }
  0x2b   : > { %293 = vst [vmem:[%s272_s12 + $0x10] sm:$0xff] %v292_v20 }
  0x2c   : > { %295 = vst [vmem:[%s272_s12 + $0x18] sm:$0xff] %v294_v21 }
  0x2d PF: > { %p669_p7 = scmp.ge.s32.totalorder %s832_s17, 1  ;;  %p300_p8 = scmp.lt.s32.totalorder %s832_s17, 3 }
  0x2f   : > { %p301_p9 = pnand %p669_p7, %p300_p8 }
  0x30   : > { %s307_s13 = sand.u32 (!%p301_p9), 1, %s824_s15  }
  0x31   : > { %304 = sbr.rel (%p301_p9) target bundleno = 246 (0xf6), region = 89  ;;  %s670_s9 = sshll.u32 (!%p301_p9), %s307_s13, 5 }
  0x32   : > { %s783_s14 = smul.u32 (!%p301_p9), 144, %s307_s13  ;;  %s316_s10 = scalar_lea.vmem (!%p301_p9), [#allocation3], %s670_s9 }
  0x33   : > { %s341_s11 = scalar_lea.vmem (!%p301_p9), [#allocation4], %s670_s9 }
  0x34   : > { %s958_s20 = scalar_lea.vmem (!%p301_p9), [#allocation2], %s783_s14 }
  0x36   : > { %v738_v22 = vld [vmem:[%s958_s20 + $0x70] sm:$0xf]  ;;  %v778_v23 = vld [vmem:[%s958_s20 + $0x74] sm:$0xf0]  ;;  %v777_v24 = vld [vmem:[%s958_s20 + $0x74] sm:$0xf] }
  0x37   : > { %v739_v25 = vor.u32 %v778_v23, %v738_v22  ;;  %v740_v26 = vld [vmem:[%s958_s20 + $0x78] sm:$0xf0]  ;;  %v730_v27 = vld [vmem:[%s958_s20 + $0x60] sm:$0xf]  ;;  %v776_v28 = vld [vmem:[%s958_s20 + $0x64] sm:$0xf0] }
  0x38   : > { %v743_v29 = vor.u32 %v777_v24, %v740_v26  ;;  %v775_v30 = vld [vmem:[%s958_s20 + $0x64] sm:$0xf]  ;;  %v732_v31 = vld [vmem:[%s958_s20 + $0x68] sm:$0xf0]  ;;  %v731_v32 = vor.u32 %v776_v28, %v730_v27  ;;  %v722_v34 = vld [vmem:[%s958_s20 + $0x50] sm:$0xf] }
  0x39   : > { %481 = vmatpush.bf16.msra.mxu0 %v739_v25  ;;  %v735_v33 = vor.u32 %v775_v30, %v732_v31  ;;  %v774_v35 = vld [vmem:[%s958_s20 + $0x54] sm:$0xf0]  ;;  %v773_v36 = vld [vmem:[%s958_s20 + $0x54] sm:$0xf]  ;;  %v724_v37 = vld [vmem:[%s958_s20 + $0x58] sm:$0xf0] }
  0x3a   : > { %509 = vmatpush.bf16.msra.mxu2 %v743_v29  ;;  %v723_v38 = vor.u32 %v774_v35, %v722_v34  ;;  %v714_v39 = vld [vmem:[%s958_s20 + $0x40] sm:$0xf]  ;;  %v761_v40 = vld [vmem:[%s1035_s0 + $0x4] sm:$0xf]  ;;  %v676_v41 = vld [vmem:[%s1035_s0 + $0x8] sm:$0xf0]  ;;  %v727_v42 = vor.u32 %v773_v36, %v724_v37 }
  0x3b   : > { %v772_v43 = vld [vmem:[%s958_s20 + $0x44] sm:$0xf0]  ;;  %v779_v44 = vld [vmem:[%s958_s20 + $0x84] sm:$0xf]  ;;  %v748_v45 = vld [vmem:[%s958_s20 + $0x88] sm:$0xf0]  ;;  %v679_v49 = vor.u32 %v761_v40, %v676_v41 }
  0x3c   : > { %v771_v46 = vld [vmem:[%s958_s20 + $0x44] sm:$0xf]  ;;  %v716_v47 = vld [vmem:[%s958_s20 + $0x48] sm:$0xf0]  ;;  %v751_v48 = vor.u32 %v779_v44, %v748_v45  ;;  %v746_v50 = vld [vmem:[%s958_s20 + $0x80] sm:$0xf]  ;;  %v715_v51 = vor.u32 %v772_v43, %v714_v39 }
  0x3d   : > { %482 = vmatpush.bf16.msra.mxu0 %v731_v32  ;;  %vm477_vm0 = vcmask 130048   ;;  %v780_v52 = vld [vmem:[%s958_s20 + $0x84] sm:$0xf0]  ;;  %v719_v53 = vor.u32 %v771_v46, %v716_v47  ;;  %v706_v54 = vld [vmem:[%s958_s20 + $0x30] sm:$0xf]  ;;  %v834_v60 = vmov 0  }
  0x3e   : > { %510 = vmatpush.bf16.msra.mxu2 %v735_v33  ;;  %530 = vmatpush.bf16.msra.mxu3 %v751_v48  ;;  %v770_v55 = vld [vmem:[%s958_s20 + $0x34] sm:$0xf0]  ;;  %v747_v56 = vor.u32 %v780_v52, %v746_v50  ;;  %v366_v57 = vld [vmem:[%s1037_s2] sm:$0xff]  ;;  %v708_v59 = vld [vmem:[%s958_s20 + $0x38] sm:$0xf0]  ;;  %s781_s15 = sshll.u32 (%p894_p5), %s660_s18, 4 }
  0x3f   : > { %v769_v58 = vld [vmem:[%s958_s20 + $0x34] sm:$0xf]  ;;  %809 = vset.pattern.permute.xlu0 %v834_v60  ;;  %v707_v61 = vor.u32 %v770_v55, %v706_v54  ;;  %v698_v63 = vld [vmem:[%s958_s20 + $0x20] sm:$0xf]  ;;  %v768_v0 = vld [vmem:[%s958_s20 + $0x24] sm:$0xf0]  ;;  %s562_s14 = scalar_lea.vmem (%p894_p5), %s1039_s4, %s781_s15 }
  0x40   : > { %502 = vmatpush.bf16.msra.mxu1 %v747_v56  ;;  %370 = vperm.xlu0 %809, %v366_v57   ;;  %v711_v62 = vor.u32 %v769_v58, %v708_v59  ;;  %v767_v1 = vld [vmem:[%s958_s20 + $0x24] sm:$0xf]  ;;  %v700_v2 = vld [vmem:[%s958_s20 + $0x28] sm:$0xf0]  ;;  %v699_v3 = vor.u32 %v768_v0, %v698_v63  ;;  %v690_v5 = vld [vmem:[%s958_s20 + $0x10] sm:$0xf] }
  0x41   : > { %483 = vmatpush.bf16.msra.mxu0 %v723_v38  ;;  %753 = vmatmul.msk.bf16.vlgmr.msra.gmra.mxu3 %vm477_vm0, %v679_v49  ;;  %v703_v4 = vor.u32 %v767_v1, %v700_v2  ;;  %v766_v6 = vld [vmem:[%s958_s20 + $0x14] sm:$0xf0]  ;;  %v765_v8 = vld [vmem:[%s958_s20 + $0x14] sm:$0xf]  ;;  %v692_v9 = vld [vmem:[%s958_s20 + $0x18] sm:$0xf0] }
  0x42   : > { %511 = vmatpush.bf16.msra.mxu2 %v727_v42  ;;  %v367_v7 = vld [vmem:[%s1037_s2 + $0x8] sm:$0xff]  ;;  %v691_v10 = vor.u32 %v766_v6, %v690_v5  ;;  %v695_v11 = vor.u32 %v765_v8, %v692_v9  ;;  %v682_v12 = vld [vmem:[%s958_s20] sm:$0xf]  ;;  %v763_v14 = vld [vmem:[%s958_s20 + $0x4] sm:$0xf] }
  0x43   : > { %752 = vmatmul.msk.bf16.vlgmr.msra.gmra.mxu1 %vm477_vm0, %v679_v49  ;;  %v764_v13 = vld [vmem:[%s958_s20 + $0x4] sm:$0xf0]  ;;  %v684_v15 = vld [vmem:[%s958_s20 + $0x8] sm:$0xf0]  ;;  %v674_v17 = vld [vmem:[%s1035_s0] sm:$0xf] }
  0x44   : > { %v683_v16 = vor.u32 %v764_v13, %v682_v12  ;;  %v762_v18 = vld [vmem:[%s1035_s0 + $0x4] sm:$0xf0]  ;;  %v687_v19 = vor.u32 %v763_v14, %v684_v15  ;;  %v541_v26 = vld [vmem:[%s316_s10] sm:$0xff]  ;;  %v543_v40 = vld [vmem:[%s316_s10 + $0x10] sm:$0xff] }
  0x45   : > { %484 = vmatpush.bf16.msra.mxu0 %v715_v51  ;;  %v675_v20 = vor.u32 %v762_v18, %v674_v17  ;;  %v542_v37 = vld [vmem:[%s316_s10 + $0x8] sm:$0xff]  ;;  %v544_v48 = vld [vmem:[%s316_s10 + $0x18] sm:$0xff] }
  0x46   : > { %512 = vmatpush.bf16.msra.mxu2 %v719_v53 }
  0x48   : > { %375 = vperm.xlu0 %809, %v367_v7  }
  0x49   : > { %485 = vmatpush.bf16.msra.mxu0 %v707_v61 }
  0x4a   : > { %513 = vmatpush.bf16.msra.mxu2 %v711_v62 }
  0x4d   : > { %486 = vmatpush.bf16.msra.mxu0 %v699_v3 }
  0x4e   : > { %514 = vmatpush.bf16.msra.mxu2 %v703_v4 }
  0x51   : > { %487 = vmatpush.bf16.msra.mxu0 %v691_v10 }
  0x52   : > { %515 = vmatpush.bf16.msra.mxu2 %v695_v11 }
  0x55   : > { %488 = vmatpush.bf16.msra.mxu0 %v683_v16 }
  0x56   : > { %516 = vmatpush.bf16.msra.mxu2 %v687_v19 }
  0x58   : > { %489 = vmatmul.bf16.vlgmr.msra.gmra.mxu0 %v675_v20 }
  0x59   : > { %517 = vmatmul.bf16.vlgmr.msra.gmra.mxu2 %v675_v20 }
  0xb2   : > { %v371_v21 = vpop.permute.xlu0 %370 }
  0xba   : > { %v376_v31 = vpop.permute.xlu0 %375 }
  0xc0   : > { %v504_v23 = vpop.f32.mrf.mxu1 }
  0xc4   : > { %v532_v29 = vpop.f32.mrf.mxu3 }
  0xc8   : > { %v506_v36 = vpop.f32.mrf.mxu1 }
  0xcc   : > { %v534_v46 = vpop.f32.mrf.mxu3 }
  0xd5   : > { %v490_v22 = vpop.f32.mrf.mxu0 }
  0xd6   : > { %v491_v24 = vadd.f32 %v490_v22, %v371_v21 }
  0xd8   : > { %v505_v25 = vadd.f32 %v504_v23, %v491_v24 }
  0xda   : > { %v537_v27 = vmax.f32 %v505_v25, 0.0 }
  0xdc   : > { %v545_v28 = vadd.f32 %v541_v26, %v537_v27  ;;  %v518_v30 = vpop.f32.mrf.mxu2 }
  0xdd   : > { %v519_v32 = vadd.f32 %v518_v30, %v371_v21  ;;  %v492_v33 = vpop.f32.mrf.mxu0 }
  0xde   : > { %549 = vst [vmem:[%s341_s11] sm:$0xff] %v545_v28  ;;  %v493_v34 = vadd.f32 %v492_v33, %v376_v31 }
  0xdf   : > { %v533_v35 = vadd.f32 %v532_v29, %v519_v32 }
  0xe0   : > { %v507_v38 = vadd.f32 %v506_v36, %v493_v34 }
  0xe1   : > { %v538_v39 = vmax.f32 %v533_v35, 0.0 }
  0xe2   : > { %v539_v41 = vmax.f32 %v507_v38, 0.0 }
  0xe3   : > { %v546_v42 = vadd.f32 %v542_v37, %v538_v39 }
  0xe4   : > { %v547_v43 = vadd.f32 %v543_v40, %v539_v41  ;;  %v520_v44 = vpop.f32.mrf.mxu2 }
  0xe5   : > { %550 = vst [vmem:[%s341_s11 + $0x8] sm:$0xff] %v546_v42  ;;  %v521_v45 = vadd.f32 %v520_v44, %v376_v31  ;;  %v575_v51 = vld [vmem:[%s341_s11] sm:$0xff] (%p894_p5) }
  0xe6   : > { %551 = vst [vmem:[%s341_s11 + $0x10] sm:$0xff] %v547_v43 }
  0xe7   : > { %v535_v47 = vadd.f32 %v534_v46, %v521_v45  ;;  %576 = vst [vmem:[%s562_s14] sm:$0xff] (%p894_p5), %v575_v51 }
  0xe9   : > { %v540_v49 = vmax.f32 %v535_v47, 0.0  ;;  %559 = sbr.rel (!%p894_p5) target bundleno = 246 (0xf6), region = 101 }
  0xeb   : > { %v548_v50 = vadd.f32 %v544_v48, %v540_v49 }
  0xec   : > { %v577_v52 = vld [vmem:[%s341_s11 + $0x8] sm:$0xff] (%p894_p5) }
  0xed   : > { %552 = vst [vmem:[%s341_s11 + $0x18] sm:$0xff] %v548_v50  ;;  %v579_v53 = vld [vmem:[%s341_s11 + $0x10] sm:$0xff] (%p894_p5) }
  0xee   : > { %578 = vst [vmem:[%s562_s14 + $0x8] sm:$0xff] %v577_v52 }
  0xef   : > { %580 = vst [vmem:[%s562_s14 + $0x20] sm:$0xff] %v579_v53 }
  0xf4   : > { %v581_v54 = vld [vmem:[%s341_s11 + $0x18] sm:$0xff] }
  0xf5   : > { %582 = vst [vmem:[%s562_s14 + $0x28] sm:$0xff] %v581_v54 }
  0xf6 PF: > { %p11_p10 = scmp.ge.s32.totalorder %s877_s19, 4   ;;  %s1042_s15 = smov %s828_s16 }
  0xf7   : > { %s1043_s16 = smov %s888_s22  ;;  %s1044_s17 = smov %s877_s19 }
  0xf8   :  { %13 = sbr.rel (!%p11_p10) target bundleno = 2 (0x2), region = 163 }

// kernel: generator_forward.24
= control target key start
LH: loop header
LB: loop body
LE: loop exit
PB: predicated region body
PF: predicated region fallthrough
CT: control target
= control target key end

     0   :  { %s825_s12 = smov 0   ;;  %s827_s13 = smov 0   ;;  %s1025_s0 = inlined_call_operand.vmem [shape: bf16[32,144], index: 0, kind: input, shape index: {}]   ;;  %s1026_s1 = inlined_call_operand.vmem [shape: bf16[144,512], index: 1, kind: input, shape index: {}]   ;;  %s1027_s2 = inlined_call_operand.vmem [shape: f32[32,1], index: 2, kind: input, shape index: {}]   ;;  %s1028_s3 = inlined_call_operand.vmem [shape: f32[32,512], index: 3, kind: output, shape index: {}]  }
   0x1   :  { %s829_s14 = smov 0  }
   0x2 LB: > { %s622_s15 = sadd.s32 4294967295, %s802_s14   ;;  %s842_s16 = sadd.s32 1, %s802_s14   ;;  %s802_s14 = sphi %s829_s14, %s1032_s14   ;;  %s798_s13 = sphi %s827_s13, %s1031_s13   ;;  %s794_s12 = sphi %s825_s12, %s1030_s12  }
   0x3   : > { %s38_s17 = ssub.s32 %s802_s14, %s842_s16  ;;  %s41_s18 = sadd.s32 1, %s798_s13 }
   0x4   : > { %p39_p0 = scmp.eq.s32.totalorder %s38_s17, 0  ;;  %p48_p1 = scmp.ne.s32.totalorder %s798_s13, %s794_s12 }
   0x5   : > { %p49_p2 = scmp.eq.s32.totalorder %s802_s14, 0  ;;  %p99_p3 = scmp.eq.s32.totalorder %s622_s15, 1 }
   0x6   : > { %s853_s19 = scalar_select %p39_p0, %s798_s13, %s41_s18  }
   0x7   : > { %p50_p4 = por %p49_p2, %p48_p1  ;;  %p855_p5 = por %p99_p3, %p48_p1 }
   0x8   : > { %p625_p6 = scmp.ge.s32.totalorder %s802_s14, 2 }
   0xa   : > { %127 = sbr.rel (%p625_p6) target bundleno = 37 (0x25), region = 24 }
   0xf   : > { %130 = sbr.rel (!%p50_p4) target bundleno = 37 (0x25), region = 28  ;;  %s132_s21 = sand.u32 (%p50_p4), 1, %s798_s13  }
  0x10   : > { %s727_s22 = sshll.u32 (%p50_p4), %s802_s14, 3  ;;  %s751_s23 = smul.u32 (%p50_p4), 144, %s132_s21 }
  0x11   : > { %s865_s26 = scalar_lea.vmem (%p50_p4), %s1026_s1, %s727_s22 }
  0x12   : > { %v200_v0 = vld [vmem:[%s865_s26] sm:$0xff] (%p50_p4)  ;;  %v202_v1 = vld [vmem:[%s865_s26 + $0x10] sm:$0xff] (%p50_p4)  ;;  %s870_s27 = scalar_lea.vmem (%p50_p4), [#allocation2], %s751_s23 }
  0x13   : > { %v204_v2 = vld [vmem:[%s865_s26 + $0x20] sm:$0xff] (%p50_p4)  ;;  %201 = vst [vmem:[%s870_s27] sm:$0xff] (%p50_p4), %v200_v0  ;;  %v206_v3 = vld [vmem:[%s865_s26 + $0x30] sm:$0xff] (%p50_p4) }
  0x14   : > { %203 = vst [vmem:[%s870_s27 + $0x8] sm:$0xff] %v202_v1  ;;  %v208_v4 = vld [vmem:[%s865_s26 + $0x40] sm:$0xff]  ;;  %v210_v5 = vld [vmem:[%s865_s26 + $0x50] sm:$0xff] }
  0x15   : > { %205 = vst [vmem:[%s870_s27 + $0x10] sm:$0xff] %v204_v2  ;;  %v212_v6 = vld [vmem:[%s865_s26 + $0x60] sm:$0xff]  ;;  %v214_v7 = vld [vmem:[%s865_s26 + $0x70] sm:$0xff] }
  0x16   : > { %207 = vst [vmem:[%s870_s27 + $0x18] sm:$0xff] %v206_v3  ;;  %v216_v8 = vld [vmem:[%s865_s26 + $0x80] sm:$0xff]  ;;  %v218_v9 = vld [vmem:[%s865_s26 + $0x90] sm:$0xff] }
  0x17   : > { %209 = vst [vmem:[%s870_s27 + $0x20] sm:$0xff] %v208_v4  ;;  %v220_v10 = vld [vmem:[%s865_s26 + $0xa0] sm:$0xff]  ;;  %v222_v11 = vld [vmem:[%s865_s26 + $0xb0] sm:$0xff] }
  0x18   : > { %211 = vst [vmem:[%s870_s27 + $0x28] sm:$0xff] %v210_v5  ;;  %v224_v12 = vld [vmem:[%s865_s26 + $0xc0] sm:$0xff]  ;;  %v226_v13 = vld [vmem:[%s865_s26 + $0xd0] sm:$0xff] }
  0x19   : > { %213 = vst [vmem:[%s870_s27 + $0x30] sm:$0xff] %v212_v6  ;;  %v228_v14 = vld [vmem:[%s865_s26 + $0xe0] sm:$0xff]  ;;  %v230_v15 = vld [vmem:[%s865_s26 + $0xf0] sm:$0xff] }
  0x1a   : > { %215 = vst [vmem:[%s870_s27 + $0x38] sm:$0xff] %v214_v7  ;;  %v232_v16 = vld [vmem:[%s865_s26 + $0x100] sm:$0xff]  ;;  %v234_v17 = vld [vmem:[%s865_s26 + $0x110] sm:$0xff] }
  0x1b   : > { %217 = vst [vmem:[%s870_s27 + $0x40] sm:$0xff] %v216_v8 }
  0x1c   : > { %219 = vst [vmem:[%s870_s27 + $0x48] sm:$0xff] %v218_v9 }
  0x1d   : > { %221 = vst [vmem:[%s870_s27 + $0x50] sm:$0xff] %v220_v10 }
  0x1e   : > { %223 = vst [vmem:[%s870_s27 + $0x58] sm:$0xff] %v222_v11 }
  0x1f   : > { %225 = vst [vmem:[%s870_s27 + $0x60] sm:$0xff] %v224_v12 }
  0x20   : > { %227 = vst [vmem:[%s870_s27 + $0x68] sm:$0xff] %v226_v13 }
  0x21   : > { %229 = vst [vmem:[%s870_s27 + $0x70] sm:$0xff] %v228_v14 }
  0x22   : > { %231 = vst [vmem:[%s870_s27 + $0x78] sm:$0xff] %v230_v15 }
  0x23   : > { %233 = vst [vmem:[%s870_s27 + $0x80] sm:$0xff] %v232_v16 }
  0x24   : > { %235 = vst [vmem:[%s870_s27 + $0x88] sm:$0xff] %v234_v17 }
  0x25 PF: > { %p628_p7 = scmp.ge.s32.totalorder %s802_s14, 1  ;;  %p240_p8 = scmp.lt.s32.totalorder %s802_s14, 3 }
  0x27   : > { %p241_p9 = pnand %p628_p7, %p240_p8 }
  0x28   : > { %s247_s28 = sand.u32 (!%p241_p9), 1, %s794_s12  }
  0x29   : > { %244 = sbr.rel (%p241_p9) target bundleno = 252 (0xfc), region = 66  ;;  %s629_s9 = sshll.u32 (!%p241_p9), %s247_s28, 6 }
  0x2a   : > { %s752_s29 = smul.u32 (!%p241_p9), 144, %s247_s28  ;;  %s990_s10 = scalar_lea.vmem (!%p241_p9), [#allocation3], %s629_s9 }
  0x2c   : > { %s910_s30 = scalar_lea.vmem (!%p241_p9), [#allocation2], %s752_s29 }
  0x2e   : > { %v704_v18 = vld [vmem:[%s910_s30 + $0x70] sm:$0xf]  ;;  %v747_v19 = vld [vmem:[%s910_s30 + $0x74] sm:$0xf0]  ;;  %v746_v20 = vld [vmem:[%s910_s30 + $0x74] sm:$0xf] }
  0x2f   : > { %v705_v21 = vor.u32 %v747_v19, %v704_v18  ;;  %v706_v22 = vld [vmem:[%s910_s30 + $0x78] sm:$0xf0]  ;;  %v696_v23 = vld [vmem:[%s910_s30 + $0x60] sm:$0xf]  ;;  %v745_v24 = vld [vmem:[%s910_s30 + $0x64] sm:$0xf0] }
  0x30   : > { %v709_v25 = vor.u32 %v746_v20, %v706_v22  ;;  %v744_v26 = vld [vmem:[%s910_s30 + $0x64] sm:$0xf]  ;;  %v698_v27 = vld [vmem:[%s910_s30 + $0x68] sm:$0xf0]  ;;  %v697_v28 = vor.u32 %v745_v24, %v696_v23  ;;  %v688_v30 = vld [vmem:[%s910_s30 + $0x50] sm:$0xf] }
  0x31   : > { %433 = vmatpush.bf16.msra.mxu0 %v705_v21  ;;  %v701_v29 = vor.u32 %v744_v26, %v698_v27  ;;  %v743_v31 = vld [vmem:[%s910_s30 + $0x54] sm:$0xf0]  ;;  %v742_v32 = vld [vmem:[%s910_s30 + $0x54] sm:$0xf]  ;;  %v690_v33 = vld [vmem:[%s910_s30 + $0x58] sm:$0xf0] }
  0x32   : > { %471 = vmatpush.bf16.msra.mxu2 %v709_v25  ;;  %v689_v34 = vor.u32 %v743_v31, %v688_v30  ;;  %v680_v35 = vld [vmem:[%s910_s30 + $0x40] sm:$0xf]  ;;  %v728_v36 = vld [vmem:[%s1025_s0 + $0x4] sm:$0xf]  ;;  %v634_v37 = vld [vmem:[%s1025_s0 + $0x8] sm:$0xf0]  ;;  %v693_v38 = vor.u32 %v742_v32, %v690_v33 }
  0x33   : > { %v741_v39 = vld [vmem:[%s910_s30 + $0x44] sm:$0xf0]  ;;  %v748_v40 = vld [vmem:[%s910_s30 + $0x84] sm:$0xf]  ;;  %v714_v41 = vld [vmem:[%s910_s30 + $0x88] sm:$0xf0]  ;;  %v637_v45 = vor.u32 %v728_v36, %v634_v37 }
  0x34   : > { %v740_v42 = vld [vmem:[%s910_s30 + $0x44] sm:$0xf]  ;;  %v682_v43 = vld [vmem:[%s910_s30 + $0x48] sm:$0xf0]  ;;  %v717_v44 = vor.u32 %v748_v40, %v714_v41  ;;  %v712_v46 = vld [vmem:[%s910_s30 + $0x80] sm:$0xf]  ;;  %v681_v47 = vor.u32 %v741_v39, %v680_v35 }
  0x35   : > { %434 = vmatpush.bf16.msra.mxu0 %v697_v28  ;;  %vm426_vm0 = vcmask 130048   ;;  %v749_v48 = vld [vmem:[%s910_s30 + $0x84] sm:$0xf0]  ;;  %v685_v49 = vor.u32 %v740_v42, %v682_v43  ;;  %v672_v50 = vld [vmem:[%s910_s30 + $0x30] sm:$0xf]  ;;  %v804_v56 = vmov 0  }
  0x36   : > { %472 = vmatpush.bf16.msra.mxu2 %v701_v29  ;;  %497 = vmatpush.bf16.msra.mxu3 %v717_v44  ;;  %v739_v51 = vld [vmem:[%s910_s30 + $0x34] sm:$0xf0]  ;;  %v713_v52 = vor.u32 %v749_v48, %v712_v46  ;;  %v294_v53 = vld [vmem:[%s1027_s2] sm:$0xff]  ;;  %v674_v55 = vld [vmem:[%s910_s30 + $0x38] sm:$0xf0]  ;;  %s750_s12 = sshll.u32 (%p855_p5), %s622_s15, 4 }
  0x37   : > { %v738_v54 = vld [vmem:[%s910_s30 + $0x34] sm:$0xf]  ;;  %778 = vset.pattern.permute.xlu0 %v804_v56  ;;  %779 = vset.pattern.permute.xlu1 %v804_v56  ;;  %v673_v57 = vor.u32 %v739_v51, %v672_v50  ;;  %v664_v59 = vld [vmem:[%s910_s30 + $0x20] sm:$0xf]  ;;  %v737_v60 = vld [vmem:[%s910_s30 + $0x24] sm:$0xf0]  ;;  %s534_s17 = scalar_lea.vmem (%p855_p5), %s1028_s3, %s750_s12 }
  0x38   : > { %459 = vmatpush.bf16.msra.mxu1 %v713_v52  ;;  %300 = vperm.xlu0 %778, %v294_v53   ;;  %v677_v58 = vor.u32 %v738_v54, %v674_v55  ;;  %v736_v61 = vld [vmem:[%s910_s30 + $0x24] sm:$0xf]  ;;  %v666_v62 = vld [vmem:[%s910_s30 + $0x28] sm:$0xf0]  ;;  %v665_v63 = vor.u32 %v737_v60, %v664_v59  ;;  %v656_v2 = vld [vmem:[%s910_s30 + $0x10] sm:$0xf] }
  0x39   : > { %435 = vmatpush.bf16.msra.mxu0 %v689_v34  ;;  %720 = vmatmul.msk.bf16.vlgmr.msra.gmra.mxu3 %vm426_vm0, %v637_v45  ;;  %v296_v0 = vld [vmem:[%s1027_s2 + $0x10] sm:$0xff]  ;;  %v669_v1 = vor.u32 %v736_v61, %v666_v62  ;;  %v735_v3 = vld [vmem:[%s910_s30 + $0x14] sm:$0xf0]  ;;  %v658_v6 = vld [vmem:[%s910_s30 + $0x18] sm:$0xf0] }
  0x3a   : > { %473 = vmatpush.bf16.msra.mxu2 %v693_v38  ;;  %v295_v4 = vld [vmem:[%s1027_s2 + $0x8] sm:$0xff]  ;;  %310 = vperm.xlu1 %779, %v296_v0   ;;  %v734_v5 = vld [vmem:[%s910_s30 + $0x14] sm:$0xf]  ;;  %v657_v7 = vor.u32 %v735_v3, %v656_v2  ;;  %v642_v9 = vld [vmem:[%s1025_s0 + $0x18] sm:$0xf0] }
  0x3b   : > { %718 = vmatmul.msk.bf16.vlgmr.msra.gmra.mxu1 %vm426_vm0, %v637_v45  ;;  %v730_v8 = vld [vmem:[%s1025_s0 + $0x14] sm:$0xf]  ;;  %v661_v10 = vor.u32 %v734_v5, %v658_v6  ;;  %v648_v11 = vld [vmem:[%s910_s30] sm:$0xf]  ;;  %v733_v12 = vld [vmem:[%s910_s30 + $0x4] sm:$0xf0] }
  0x3c   : > { %v732_v13 = vld [vmem:[%s910_s30 + $0x4] sm:$0xf]  ;;  %v650_v14 = vld [vmem:[%s910_s30 + $0x8] sm:$0xf0]  ;;  %v645_v16 = vor.u32 %v730_v8, %v642_v9  ;;  %v649_v17 = vor.u32 %v733_v12, %v648_v11  ;;  %v632_v18 = vld [vmem:[%s1025_s0] sm:$0xf] }
  0x3d   : > { %436 = vmatpush.bf16.msra.mxu0 %v681_v47  ;;  %v297_v15 = vld [vmem:[%s1027_s2 + $0x18] sm:$0xff]  ;;  %v729_v19 = vld [vmem:[%s1025_s0 + $0x4] sm:$0xf0]  ;;  %v653_v20 = vor.u32 %v732_v13, %v650_v14  ;;  %v640_v22 = vld [vmem:[%s1025_s0 + $0x10] sm:$0xf] }
  0x3e   : > { %474 = vmatpush.bf16.msra.mxu2 %v685_v49  ;;  %v633_v21 = vor.u32 %v729_v19, %v632_v18  ;;  %v731_v23 = vld [vmem:[%s1025_s0 + $0x14] sm:$0xf0] }
  0x3f   : > { %v641_v24 = vor.u32 %v731_v23, %v640_v22 }
  0x40   : > { %305 = vperm.xlu0 %778, %v295_v4  }
  0x41   : > { %437 = vmatpush.bf16.msra.mxu0 %v673_v57 }
  0x42   : > { %475 = vmatpush.bf16.msra.mxu2 %v677_v58  ;;  %315 = vperm.xlu1 %779, %v297_v15  }
  0x45   : > { %438 = vmatpush.bf16.msra.mxu0 %v665_v63 }
  0x46   : > { %476 = vmatpush.bf16.msra.mxu2 %v669_v1 }
  0x49   : > { %439 = vmatpush.bf16.msra.mxu0 %v657_v7  ;;  %721 = vmatmul.msk.bf16.gmra.mxu3 %vm426_vm0, %v645_v16 }
  0x4a   : > { %477 = vmatpush.bf16.msra.mxu2 %v661_v10 }
  0x4b   : > { %719 = vmatmul.msk.bf16.gmra.mxu1 %vm426_vm0, %v645_v16 }
  0x4d   : > { %440 = vmatpush.bf16.msra.mxu0 %v649_v17 }
  0x4e   : > { %478 = vmatpush.bf16.msra.mxu2 %v653_v20 }
  0x50   : > { %441 = vmatmul.bf16.vlgmr.msra.gmra.mxu0 %v633_v21 }
  0x51   : > { %479 = vmatmul.bf16.vlgmr.msra.gmra.mxu2 %v633_v21 }
  0x60   : > { %446 = vmatmul.bf16.gmra.mxu0 %v641_v24 }
  0x61   : > { %484 = vmatmul.bf16.gmra.mxu2 %v641_v24 }
  0xaa   : > { %v301_v25 = vpop.permute.xlu0 %300 }
  0xac   : > { %v311_v43 = vpop.permute.xlu1 %310 }
  0xb2   : > { %v306_v32 = vpop.permute.xlu0 %305 }
  0xb4   : > { %v316_v55 = vpop.permute.xlu1 %315 }
  0xb8   : > { %v461_v26 = vpop.f32.mrf.mxu1 }
  0xbc   : > { %v499_v30 = vpop.f32.mrf.mxu3 }
  0xc0   : > { %v463_v33 = vpop.f32.mrf.mxu1 }
  0xc4   : > { %v501_v42 = vpop.f32.mrf.mxu3 }
  0xc8   : > { %v466_v47 = vpop.f32.mrf.mxu1 }
  0xcc   : > { %v504_v53 = vpop.f32.mrf.mxu3 }
  0xcd   : > { %v442_v27 = vpop.f32.mrf.mxu0 }
  0xce   : > { %v443_v28 = vadd.f32 %v442_v27, %v301_v25 }
  0xd0   : > { %v462_v29 = vadd.f32 %v461_v26, %v443_v28  ;;  %v468_v60 = vpop.f32.mrf.mxu1 }
  0xd2   : > { %v509_v31 = vmax.f32 %v462_v29, 0.0 }
  0xd4   : > { %517 = vst [vmem:[%s990_s10] sm:$0xff] %v509_v31  ;;  %v480_v34 = vpop.f32.mrf.mxu2  ;;  %v506_v2 = vpop.f32.mrf.mxu3 }
  0xd5   : > { %v481_v35 = vadd.f32 %v480_v34, %v301_v25  ;;  %v444_v36 = vpop.f32.mrf.mxu0 }
  0xd6   : > { %v445_v37 = vadd.f32 %v444_v36, %v306_v32 }
  0xd7   : > { %v500_v38 = vadd.f32 %v499_v30, %v481_v35 }
  0xd8   : > { %v464_v39 = vadd.f32 %v463_v33, %v445_v37 }
  0xd9   : > { %v510_v40 = vmax.f32 %v500_v38, 0.0 }
  0xda   : > { %v511_v41 = vmax.f32 %v464_v39, 0.0 }
  0xdb   : > { %518 = vst [vmem:[%s990_s10 + $0x8] sm:$0xff] %v510_v40  ;;  %v547_v5 = vld [vmem:[%s990_s10] sm:$0xff] (%p855_p5) }
  0xdc   : > { %519 = vst [vmem:[%s990_s10 + $0x10] sm:$0xff] %v511_v41  ;;  %v482_v44 = vpop.f32.mrf.mxu2 }
  0xdd   : > { %v483_v45 = vadd.f32 %v482_v44, %v306_v32  ;;  %v447_v46 = vpop.f32.mrf.mxu0  ;;  %548 = vst [vmem:[%s534_s17] sm:$0xff] (%p855_p5), %v547_v5 }
  0xde   : > { %v448_v48 = vadd.f32 %v447_v46, %v311_v43 }
  0xdf   : > { %v502_v49 = vadd.f32 %v501_v42, %v483_v45 }
  0xe0   : > { %v467_v50 = vadd.f32 %v466_v47, %v448_v48 }
  0xe1   : > { %v512_v51 = vmax.f32 %v502_v49, 0.0 }
  0xe2   : > { %v513_v52 = vmax.f32 %v467_v50, 0.0  ;;  %v549_v6 = vld [vmem:[%s990_s10 + $0x8] sm:$0xff] (%p855_p5) }
  0xe3   : > { %520 = vst [vmem:[%s990_s10 + $0x18] sm:$0xff] %v512_v51  ;;  %v551_v7 = vld [vmem:[%s990_s10 + $0x10] sm:$0xff] (%p855_p5) }
  0xe4   : > { %521 = vst [vmem:[%s990_s10 + $0x20] sm:$0xff] %v513_v52  ;;  %v485_v54 = vpop.f32.mrf.mxu2 }
  0xe5   : > { %v486_v56 = vadd.f32 %v485_v54, %v311_v43  ;;  %v449_v57 = vpop.f32.mrf.mxu0  ;;  %550 = vst [vmem:[%s534_s17 + $0x8] sm:$0xff] (%p855_p5), %v549_v6 }
  0xe6   : > { %v450_v58 = vadd.f32 %v449_v57, %v316_v55  ;;  %552 = vst [vmem:[%s534_s17 + $0x20] sm:$0xff] (%p855_p5), %v551_v7 }
  0xe7   : > { %v505_v59 = vadd.f32 %v504_v53, %v486_v56 }
  0xe8   : > { %v469_v61 = vadd.f32 %v468_v60, %v450_v58 }
  0xe9   : > { %v514_v62 = vmax.f32 %v505_v59, 0.0 }
  0xea   : > { %v515_v63 = vmax.f32 %v469_v61, 0.0  ;;  %v553_v8 = vld [vmem:[%s990_s10 + $0x18] sm:$0xff] (%p855_p5) }
  0xeb   : > { %522 = vst [vmem:[%s990_s10 + $0x28] sm:$0xff] %v514_v62  ;;  %v555_v9 = vld [vmem:[%s990_s10 + $0x20] sm:$0xff] (%p855_p5) }
  0xec   : > { %523 = vst [vmem:[%s990_s10 + $0x30] sm:$0xff] %v515_v63  ;;  %v487_v0 = vpop.f32.mrf.mxu2 }
  0xed   : > { %v488_v1 = vadd.f32 %v487_v0, %v316_v55  ;;  %554 = vst [vmem:[%s534_s17 + $0x28] sm:$0xff] (%p855_p5), %v553_v8 }
  0xee   : > { %556 = vst [vmem:[%s534_s17 + $0x40] sm:$0xff] (%p855_p5), %v555_v9 }
  0xef   : > { %v507_v3 = vadd.f32 %v506_v2, %v488_v1  ;;  %531 = sbr.rel (!%p855_p5) target bundleno = 252 (0xfc), region = 74 }
  0xf1   : > { %v516_v4 = vmax.f32 %v507_v3, 0.0 }
  0xf2   : > { %v557_v10 = vld [vmem:[%s990_s10 + $0x28] sm:$0xff] (%p855_p5) }
  0xf3   : > { %524 = vst [vmem:[%s990_s10 + $0x38] sm:$0xff] %v516_v4  ;;  %v559_v11 = vld [vmem:[%s990_s10 + $0x30] sm:$0xff] (%p855_p5) }
  0xf4   : > { %558 = vst [vmem:[%s534_s17 + $0x48] sm:$0xff] %v557_v10 }
  0xf5   : > { %560 = vst [vmem:[%s534_s17 + $0x60] sm:$0xff] %v559_v11 }
  0xfa   : > { %v561_v12 = vld [vmem:[%s990_s10 + $0x38] sm:$0xff] }
  0xfb   : > { %562 = vst [vmem:[%s534_s17 + $0x68] sm:$0xff] %v561_v12 }
  0xfc PF: > { %p10_p10 = scmp.ge.s32.totalorder %s842_s16, 4   ;;  %s1030_s12 = smov %s798_s13 }
  0xfd   : > { %s1031_s13 = smov %s853_s19  ;;  %s1032_s14 = smov %s842_s16 }
  0xfe   :  { %12 = sbr.rel (!%p10_p10) target bundleno = 2 (0x2), region = 128 }

// kernel: generator_forward.25
= control target key start
LH: loop header
LB: loop body
LE: loop exit
PB: predicated region body
PF: predicated region fallthrough
CT: control target
= control target key end

     0   :  { %s634_s12 = smov 0   ;;  %s636_s13 = smov 0   ;;  %s744_s0 = inlined_call_operand.vmem [shape: bf16[4,128], index: 0, kind: input, shape index: {}]   ;;  %s745_s1 = inlined_call_operand.vmem [shape: bf16[128,512], index: 1, kind: input, shape index: {}]   ;;  %s746_s2 = inlined_call_operand.vmem [shape: f32[4,1], index: 2, kind: input, shape index: {}]   ;;  %s747_s3 = inlined_call_operand.vmem [shape: f32[4,512], index: 3, kind: output, shape index: {}]  }
   0x1   :  { %s638_s14 = smov 0  }
   0x2 LB: > { %s469_s15 = sadd.s32 4294967295, %s611_s14   ;;  %s651_s16 = sadd.s32 1, %s611_s14   ;;  %s611_s14 = sphi %s638_s14, %s750_s14   ;;  %s607_s13 = sphi %s636_s13, %s749_s13   ;;  %s603_s12 = sphi %s634_s12, %s748_s12  }
   0x3   : > { %s38_s17 = ssub.s32 %s611_s14, %s651_s16  ;;  %s41_s18 = sadd.s32 1, %s607_s13 }
   0x4   : > { %p39_p0 = scmp.eq.s32.totalorder %s38_s17, 0  ;;  %p48_p1 = scmp.ne.s32.totalorder %s607_s13, %s603_s12 }
   0x5   : > { %p49_p2 = scmp.eq.s32.totalorder %s611_s14, 0  ;;  %p472_p4 = scmp.ge.s32.totalorder %s611_s14, 2 }
   0x6   : > { %s660_s19 = scalar_select %p39_p0, %s607_s13, %s41_s18  }
   0x7   : > { %p50_p3 = por %p49_p2, %p48_p1  ;;  %127 = sbr.rel (%p472_p4) target bundleno = 32 (0x20), region = 24 }
   0xc   : > { %130 = sbr.rel (!%p50_p3) target bundleno = 32 (0x20), region = 28  ;;  %s132_s20 = sand.u32 (%p50_p3), 1, %s607_s13  }
   0xd   : > { %s546_s21 = sshll.u32 (%p50_p3), %s611_s14, 3  ;;  %s473_s22 = sshll.u32 (%p50_p3), %s132_s20, 7 }
   0xe   : > { %s668_s25 = scalar_lea.vmem (%p50_p3), %s745_s1, %s546_s21  ;;  %s134_s26 = scalar_lea.vmem (%p50_p3), [#allocation2], %s473_s22 }
   0xf   : > { %v196_v0 = vld [vmem:[%s668_s25] sm:$0xff] (%p50_p3)  ;;  %v198_v1 = vld [vmem:[%s668_s25 + $0x10] sm:$0xff] (%p50_p3) }
  0x10   : > { %v200_v2 = vld [vmem:[%s668_s25 + $0x20] sm:$0xff] (%p50_p3)  ;;  %197 = vst [vmem:[%s134_s26] sm:$0xff] (%p50_p3), %v196_v0  ;;  %v202_v3 = vld [vmem:[%s668_s25 + $0x30] sm:$0xff] (%p50_p3) }
  0x11   : > { %199 = vst [vmem:[%s134_s26 + $0x8] sm:$0xff] %v198_v1  ;;  %v204_v4 = vld [vmem:[%s668_s25 + $0x40] sm:$0xff]  ;;  %v206_v5 = vld [vmem:[%s668_s25 + $0x50] sm:$0xff] }
  0x12   : > { %201 = vst [vmem:[%s134_s26 + $0x10] sm:$0xff] %v200_v2  ;;  %v208_v6 = vld [vmem:[%s668_s25 + $0x60] sm:$0xff]  ;;  %v210_v7 = vld [vmem:[%s668_s25 + $0x70] sm:$0xff] }
  0x13   : > { %203 = vst [vmem:[%s134_s26 + $0x18] sm:$0xff] %v202_v3  ;;  %v212_v8 = vld [vmem:[%s668_s25 + $0x80] sm:$0xff]  ;;  %v214_v9 = vld [vmem:[%s668_s25 + $0x90] sm:$0xff] }
  0x14   : > { %205 = vst [vmem:[%s134_s26 + $0x20] sm:$0xff] %v204_v4  ;;  %v216_v10 = vld [vmem:[%s668_s25 + $0xa0] sm:$0xff]  ;;  %v218_v11 = vld [vmem:[%s668_s25 + $0xb0] sm:$0xff] }
  0x15   : > { %207 = vst [vmem:[%s134_s26 + $0x28] sm:$0xff] %v206_v5  ;;  %v220_v12 = vld [vmem:[%s668_s25 + $0xc0] sm:$0xff]  ;;  %v222_v13 = vld [vmem:[%s668_s25 + $0xd0] sm:$0xff] }
  0x16   : > { %209 = vst [vmem:[%s134_s26 + $0x30] sm:$0xff] %v208_v6  ;;  %v224_v14 = vld [vmem:[%s668_s25 + $0xe0] sm:$0xff]  ;;  %v226_v15 = vld [vmem:[%s668_s25 + $0xf0] sm:$0xff] }
  0x17   : > { %211 = vst [vmem:[%s134_s26 + $0x38] sm:$0xff] %v210_v7 }
  0x18   : > { %213 = vst [vmem:[%s134_s26 + $0x40] sm:$0xff] %v212_v8 }
  0x19   : > { %215 = vst [vmem:[%s134_s26 + $0x48] sm:$0xff] %v214_v9 }
  0x1a   : > { %217 = vst [vmem:[%s134_s26 + $0x50] sm:$0xff] %v216_v10 }
  0x1b   : > { %219 = vst [vmem:[%s134_s26 + $0x58] sm:$0xff] %v218_v11 }
  0x1c   : > { %221 = vst [vmem:[%s134_s26 + $0x60] sm:$0xff] %v220_v12 }
  0x1d   : > { %223 = vst [vmem:[%s134_s26 + $0x68] sm:$0xff] %v222_v13 }
  0x1e   : > { %225 = vst [vmem:[%s134_s26 + $0x70] sm:$0xff] %v224_v14 }
  0x1f   : > { %227 = vst [vmem:[%s134_s26 + $0x78] sm:$0xff] %v226_v15 }
  0x20 PF: > { %p476_p5 = scmp.ge.s32.totalorder %s611_s14, 1  ;;  %p232_p6 = scmp.lt.s32.totalorder %s611_s14, 3 }
  0x22   : > { %p233_p7 = pnand %p476_p5, %p232_p6 }
  0x23   : > { %s239_s27 = sand.u32 (!%p233_p7), 1, %s603_s12   ;;  %s478_s7 = sshll.u32 (!%p233_p7), %s469_s15, 1 }
  0x24   : > { %236 = sbr.rel (%p233_p7) target bundleno = 210 (0xd2), region = 66  ;;  %s477_s28 = sshll.u32 (!%p233_p7), %s239_s27, 7 }
  0x25   : > { %s689_s29 = scalar_lea.vmem (!%p233_p7), [#allocation2], %s477_s28  ;;  %p264_p8 = scmp.lt.s32.totalorder (!%p233_p7), %s478_s7, 3 }
  0x29   : > { %v538_v16 = vld [vmem:[%s689_s29 + $0x70] sm:$0xf]  ;;  %v562_v17 = vld [vmem:[%s689_s29 + $0x74] sm:$0xf0]  ;;  %v561_v18 = vld [vmem:[%s689_s29 + $0x74] sm:$0xf] }
  0x2a   : > { %v539_v19 = vor.u32 %v562_v17, %v538_v16  ;;  %v540_v20 = vld [vmem:[%s689_s29 + $0x78] sm:$0xf0]  ;;  %v530_v21 = vld [vmem:[%s689_s29 + $0x60] sm:$0xf]  ;;  %v560_v22 = vld [vmem:[%s689_s29 + $0x64] sm:$0xf0] }
  0x2b   : > { %v543_v23 = vor.u32 %v561_v18, %v540_v20  ;;  %v559_v24 = vld [vmem:[%s689_s29 + $0x64] sm:$0xf]  ;;  %v532_v25 = vld [vmem:[%s689_s29 + $0x68] sm:$0xf0]  ;;  %v531_v26 = vor.u32 %v560_v22, %v530_v21  ;;  %v522_v28 = vld [vmem:[%s689_s29 + $0x50] sm:$0xf] }
  0x2c   : > { %372 = vmatpush.bf16.msra.mxu0 %v539_v19  ;;  %v535_v27 = vor.u32 %v559_v24, %v532_v25  ;;  %v558_v29 = vld [vmem:[%s689_s29 + $0x54] sm:$0xf0]  ;;  %v557_v30 = vld [vmem:[%s689_s29 + $0x54] sm:$0xf]  ;;  %v524_v31 = vld [vmem:[%s689_s29 + $0x58] sm:$0xf0] }
  0x2d   : > { %385 = vmatpush.bf16.msra.mxu1 %v543_v23  ;;  %v523_v32 = vor.u32 %v558_v29, %v522_v28  ;;  %v527_v33 = vor.u32 %v557_v30, %v524_v31  ;;  %v514_v34 = vld [vmem:[%s689_s29 + $0x40] sm:$0xf]  ;;  %v556_v35 = vld [vmem:[%s689_s29 + $0x44] sm:$0xf0]  ;;  %v555_v36 = vld [vmem:[%s689_s29 + $0x44] sm:$0xf] }
  0x2e   : > { %v516_v37 = vld [vmem:[%s689_s29 + $0x48] sm:$0xf0]  ;;  %v515_v38 = vor.u32 %v556_v35, %v514_v34  ;;  %v286_v39 = vld [vmem:[%s746_s2] sm:$0xf]  ;;  %v506_v41 = vld [vmem:[%s689_s29 + $0x30] sm:$0xf] }
  0x2f   : > { %v519_v40 = vor.u32 %v555_v36, %v516_v37  ;;  %v554_v42 = vld [vmem:[%s689_s29 + $0x34] sm:$0xf0]  ;;  %v613_v43 = vmov 0   ;;  %v553_v44 = vld [vmem:[%s689_s29 + $0x34] sm:$0xf]  ;;  %s752_s7 = smov (!%p264_p8, %s478_s7), 3 }
  0x30   : > { %373 = vmatpush.bf16.msra.mxu0 %v531_v26  ;;  %588 = vset.pattern.permute.xlu0 %v613_v43  ;;  %v508_v45 = vld [vmem:[%s689_s29 + $0x38] sm:$0xf0]  ;;  %v507_v46 = vor.u32 %v554_v42, %v506_v41  ;;  %v498_v48 = vld [vmem:[%s689_s29 + $0x20] sm:$0xf]  ;;  %v552_v49 = vld [vmem:[%s689_s29 + $0x24] sm:$0xf0] }
  0x31   : > { %386 = vmatpush.bf16.msra.mxu1 %v535_v27  ;;  %289 = vperm.xlu0 %588, %v286_v39   ;;  %v511_v47 = vor.u32 %v553_v44, %v508_v45  ;;  %v551_v50 = vld [vmem:[%s689_s29 + $0x24] sm:$0xf]  ;;  %v500_v51 = vld [vmem:[%s689_s29 + $0x28] sm:$0xf0]  ;;  %v499_v52 = vor.u32 %v552_v49, %v498_v48  ;;  %v490_v54 = vld [vmem:[%s689_s29 + $0x10] sm:$0xf] }
  0x32   : > { %v503_v53 = vor.u32 %v551_v50, %v500_v51  ;;  %v550_v55 = vld [vmem:[%s689_s29 + $0x14] sm:$0xf0]  ;;  %v549_v56 = vld [vmem:[%s689_s29 + $0x14] sm:$0xf]  ;;  %v492_v57 = vld [vmem:[%s689_s29 + $0x18] sm:$0xf0] }
  0x33   : > { %v491_v58 = vor.u32 %v550_v55, %v490_v54  ;;  %v495_v59 = vor.u32 %v549_v56, %v492_v57  ;;  %v482_v60 = vld [vmem:[%s689_s29] sm:$0xf]  ;;  %v548_v61 = vld [vmem:[%s689_s29 + $0x4] sm:$0xf0]  ;;  %v547_v62 = vld [vmem:[%s689_s29 + $0x4] sm:$0xf] }
  0x34   : > { %374 = vmatpush.bf16.msra.mxu0 %v523_v32  ;;  %v484_v63 = vld [vmem:[%s689_s29 + $0x8] sm:$0xf0]  ;;  %v483_v0 = vor.u32 %v548_v61, %v482_v60  ;;  %v269_v2 = vld [vmem:[%s744_s0] sm:$0x3]  ;;  %s479_s8 = sshll.u32 %s752_s7, 2  ;;  %vm403_vm0 = vcmask 1043456  }
  0x35   : > { %387 = vmatpush.bf16.msra.mxu1 %v527_v33  ;;  %v487_v1 = vor.u32 %v547_v62, %v484_v63  ;;  %s267_s11 = scalar_lea.vmem %s747_s3, %s479_s8 }
  0x38   : > { %375 = vmatpush.bf16.msra.mxu0 %v515_v38 }
  0x39   : > { %388 = vmatpush.bf16.msra.mxu1 %v519_v40 }
  0x3c   : > { %376 = vmatpush.bf16.msra.mxu0 %v507_v46 }
  0x3d   : > { %389 = vmatpush.bf16.msra.mxu1 %v511_v47 }
  0x40   : > { %377 = vmatpush.bf16.msra.mxu0 %v499_v52 }
  0x41   : > { %390 = vmatpush.bf16.msra.mxu1 %v503_v53 }
  0x44   : > { %378 = vmatpush.bf16.msra.mxu0 %v491_v58 }
  0x45   : > { %391 = vmatpush.bf16.msra.mxu1 %v495_v59 }
  0x48   : > { %379 = vmatpush.bf16.msra.mxu0 %v483_v0 }
  0x49   : > { %392 = vmatpush.bf16.msra.mxu1 %v487_v1 }
  0x4b   : > { %380 = vmatmul.bf16.vlgmr.msra.gmra.mxu0 %v269_v2 }
  0x4c   : > { %393 = vmatmul.bf16.vlgmr.msra.gmra.mxu1 %v269_v2 }
  0xa3   : > { %v290_v3 = vpop.permute.xlu0 %289 }
  0xc8   : > { %v381_v4 = vpop.f32.mrf.mxu0 }
  0xc9   : > { %v394_v5 = vpop.f32.mrf.mxu1  ;;  %v382_v6 = vadd.f32 %v381_v4, %v290_v3 }
  0xca   : > { %v395_v7 = vadd.f32 %v394_v5, %v290_v3 }
  0xcb   : > { %v398_v9 = vmax.f32 %v382_v6, 0.0 }
  0xcc   : > { %v399_v8 = vmax.f32 %v395_v7, 0.0 }
  0xce   : > { %v402_v10 = vrot.slane %v399_v8, 4 }
  0xd0   : > { %v404_v11 = vsel %vm403_vm0, %v398_v9, %v402_v10  ;;  %v383_v12 = vpop.f32.mrf.mxu0 }
  0xd1   : > { %406 = vst [vmem:[%s267_s11] sm:$0xff] %v404_v11  ;;  %v396_v13 = vpop.f32.mrf.mxu1 }
  0xd2 PF: > { %p10_p9 = scmp.ge.s32.totalorder %s651_s16, 4   ;;  %s748_s12 = smov %s607_s13 }
  0xd3   : > { %s749_s13 = smov %s660_s19  ;;  %s750_s14 = smov %s651_s16 }
  0xd4   :  { %12 = sbr.rel (!%p10_p9) target bundleno = 2 (0x2), region = 105 }

// kernel: generator_forward.26
= control target key start
LH: loop header
LB: loop body
LE: loop exit
PB: predicated region body
PF: predicated region fallthrough
CT: control target
= control target key end

     0   :  { %s520_s12 = smov 0   ;;  %s522_s13 = smov 0   ;;  %s596_s0 = inlined_call_operand.vmem [shape: bf16[12,36], index: 0, kind: input, shape index: {}]   ;;  %s597_s1 = inlined_call_operand.vmem [shape: bf16[36,512], index: 1, kind: input, shape index: {}]   ;;  %s598_s2 = inlined_call_operand.vmem [shape: f32[12,1], index: 2, kind: input, shape index: {}]   ;;  %s599_s3 = inlined_call_operand.vmem [shape: f32[12,512], index: 3, kind: output, shape index: {}]  }
   0x1   :  { %s524_s14 = smov 0  }
   0x2 LB: > { %s405_s15 = sadd.s32 4294967295, %s497_s14   ;;  %s537_s16 = sadd.s32 1, %s497_s14   ;;  %s497_s14 = sphi %s524_s14, %s603_s14   ;;  %s493_s13 = sphi %s522_s13, %s602_s13   ;;  %s489_s12 = sphi %s520_s12, %s601_s12  }
   0x3   : > { %s38_s17 = ssub.s32 %s497_s14, %s537_s16  ;;  %s41_s18 = sadd.s32 1, %s493_s13 }
   0x4   : > { %p39_p0 = scmp.eq.s32.totalorder %s38_s17, 0  ;;  %p48_p1 = scmp.ne.s32.totalorder %s493_s13, %s489_s12 }
   0x5   : > { %p49_p2 = scmp.eq.s32.totalorder %s497_s14, 0  ;;  %p99_p3 = scmp.eq.s32.totalorder %s405_s15, 1 }
   0x6   : > { %s548_s19 = scalar_select %p39_p0, %s493_s13, %s41_s18  }
   0x7   : > { %p50_p4 = por %p49_p2, %p48_p1  ;;  %p550_p5 = por %p99_p3, %p48_p1 }
   0x8   : > { %p408_p6 = scmp.ge.s32.totalorder %s497_s14, 2 }
   0xa   : > { %127 = sbr.rel (%p408_p6) target bundleno = 24 (0x18), region = 24 }
   0xf   : > { %130 = sbr.rel (!%p50_p4) target bundleno = 24 (0x18), region = 28  ;;  %s132_s21 = sand.u32 (%p50_p4), 1, %s493_s13  }
  0x10   : > { %s440_s22 = sshll.u32 (%p50_p4), %s497_s14, 3  ;;  %s447_s23 = smul.u32 (%p50_p4), 40, %s132_s21 }
  0x11   : > { %s137_s26 = scalar_lea.vmem (%p50_p4), %s597_s1, %s440_s22 }
  0x12   : > { %v174_v0 = vld [vmem:[%s137_s26] sm:$0xff] (%p50_p4)  ;;  %v176_v1 = vld [vmem:[%s137_s26 + $0x10] sm:$0xff] (%p50_p4)  ;;  %s134_s27 = scalar_lea.vmem (%p50_p4), [#allocation2], %s447_s23 }
  0x13   : > { %v178_v2 = vld [vmem:[%s137_s26 + $0x20] sm:$0xff] (%p50_p4)  ;;  %175 = vst [vmem:[%s134_s27] sm:$0xff] (%p50_p4), %v174_v0  ;;  %v180_v3 = vld [vmem:[%s137_s26 + $0x30] sm:$0xff] (%p50_p4) }
  0x14   : > { %177 = vst [vmem:[%s134_s27 + $0x8] sm:$0xff] %v176_v1  ;;  %v182_v4 = vld [vmem:[%s137_s26 + $0x40] sm:$0xff] }
  0x15   : > { %179 = vst [vmem:[%s134_s27 + $0x10] sm:$0xff] %v178_v2 }
  0x16   : > { %181 = vst [vmem:[%s134_s27 + $0x18] sm:$0xff] %v180_v3 }
  0x17   : > { %183 = vst [vmem:[%s134_s27 + $0x20] sm:$0xff] %v182_v4 }
  0x18 PF: > { %p411_p7 = scmp.ge.s32.totalorder %s497_s14, 1  ;;  %p188_p8 = scmp.lt.s32.totalorder %s497_s14, 3 }
  0x1a   : > { %p189_p9 = pnand %p411_p7, %p188_p8 }
  0x1b   : > { %s195_s28 = sand.u32 (!%p189_p9), 1, %s489_s12  }
  0x1c   : > { %192 = sbr.rel (%p189_p9) target bundleno = 199 (0xc7), region = 66  ;;  %s412_s17 = sshll.u32 (!%p189_p9), %s195_s28, 5 }
  0x1d   : > { %s448_s29 = smul.u32 (!%p189_p9), 40, %s195_s28  ;;  %s216_s18 = scalar_lea.vmem (!%p189_p9), [#allocation3], %s412_s17 }
  0x1f   : > { %s197_s5 = scalar_lea.vmem (!%p189_p9), [#allocation2], %s448_s29 }
  0x21   : > { %v227_v5 = vld [vmem:[%s598_s2] sm:$0xff]  ;;  %v499_v6 = vmov 0   ;;  %vm273_vm0 = vcmask 1041408   ;;  %v427_v10 = vld [vmem:[%s197_s5 + $0x10] sm:$0xf]  ;;  %vm269_vm1 = vcmask 293888  }
  0x22   : > { %474 = vset.pattern.permute.xlu0 %v499_v6  ;;  %v226_v7 = vld [vmem:[%s197_s5 + $0x20] sm:$0x33]  ;;  %v445_v13 = vld [vmem:[%s197_s5 + $0x14] sm:$0xf0]  ;;  %v444_v14 = vld [vmem:[%s197_s5 + $0x14] sm:$0xf] }
  0x23   : > { %231 = vperm.xlu0 %474, %v227_v5   ;;  %v257_v8 = vunpack.c.l.b16 %v226_v7  ;;  %v258_v9 = vunpack.c.h.b16 %v226_v7  ;;  %v429_v15 = vld [vmem:[%s197_s5 + $0x18] sm:$0xf0]  ;;  %v228_v16 = vld [vmem:[%s598_s2 + $0x8] sm:$0xf]  ;;  %v428_v19 = vor.u32 %v445_v13, %v427_v10  ;;  %v442_v23 = vld [vmem:[%s197_s5 + $0x4] sm:$0xf] }
  0x24   : > { %v432_v20 = vor.u32 %v444_v14, %v429_v15  ;;  %v419_v21 = vld [vmem:[%s197_s5] sm:$0xf]  ;;  %v443_v22 = vld [vmem:[%s197_s5 + $0x4] sm:$0xf0]  ;;  %v421_v24 = vld [vmem:[%s197_s5 + $0x8] sm:$0xf0] }
  0x25   : > { %v263_v11 = vpack.c.b16 %v257_v8, %v257_v8  ;;  %v264_v12 = vpack.c.b16 %v258_v9, %v258_v9  ;;  %v420_v25 = vor.u32 %v443_v22, %v419_v21  ;;  %v424_v26 = vor.u32 %v442_v23, %v421_v24  ;;  %v415_v27 = vld [vmem:[%s596_s0] sm:$0xf]  ;;  %v441_v28 = vld [vmem:[%s596_s0] sm:$0x30]  ;;  %s446_s12 = sshll.u32 (%p550_p5), %s405_s15, 4 }
  0x26   : > { %v416_v29 = vor.u32 %v441_v28, %v415_v27  ;;  %s325_s23 = scalar_lea.vmem (%p550_p5), %s599_s3, %s446_s12 }
  0x27   : > { %v275_v17 = vsel %vm273_vm0, %v263_v11, 0  ;;  %v278_v18 = vsel %vm273_vm0, %v264_v12, 0 }
  0x28   : > { %285 = vmatpush.bf16.msra.mxu0 %v275_v17  ;;  %299 = vmatpush.bf16.msra.mxu1 %v278_v18 }
  0x2b   : > { %236 = vperm.xlu0 %474, %v228_v16  }
  0x2c   : > { %286 = vmatpush.bf16.msra.mxu0 %v428_v19  ;;  %300 = vmatpush.bf16.msra.mxu1 %v432_v20 }
  0x30   : > { %287 = vmatpush.bf16.msra.mxu0 %v420_v25  ;;  %301 = vmatpush.bf16.msra.mxu1 %v424_v26 }
  0x33   : > { %433 = vmatmul.msk.bf16.vlgmr.msra.gmra.mxu0 %vm269_vm1, %v416_v29  ;;  %434 = vmatmul.msk.bf16.vlgmr.msra.gmra.mxu1 %vm269_vm1, %v416_v29 }
  0x95   : > { %v232_v30 = vpop.permute.xlu0 %231 }
  0x9d   : > { %v237_v37 = vpop.permute.xlu0 %236 }
  0xb0   : > { %v289_v31 = vpop.f32.mrf.mxu0  ;;  %v303_v32 = vpop.f32.mrf.mxu1 }
  0xb1   : > { %v290_v33 = vadd.f32 %v289_v31, %v232_v30  ;;  %v304_v34 = vadd.f32 %v303_v32, %v232_v30 }
  0xb3   : > { %v308_v35 = vmax.f32 %v290_v33, 0.0  ;;  %v309_v36 = vmax.f32 %v304_v34, 0.0 }
  0xb5   : > { %312 = vst [vmem:[%s216_s18] sm:$0xff] %v308_v35 }
  0xb6   : > { %313 = vst [vmem:[%s216_s18 + $0x8] sm:$0xff] %v309_v36 }
  0xb8   : > { %v291_v38 = vpop.f32.mrf.mxu0  ;;  %v305_v39 = vpop.f32.mrf.mxu1 }
  0xb9   : > { %v292_v40 = vadd.f32 %v291_v38, %v237_v37  ;;  %v306_v41 = vadd.f32 %v305_v39, %v237_v37 }
  0xba   : > { %322 = sbr.rel (!%p550_p5) target bundleno = 199 (0xc7), region = 74 }
  0xbb   : > { %v310_v42 = vmax.f32 %v292_v40, 0.0  ;;  %v311_v43 = vmax.f32 %v306_v41, 0.0 }
  0xbc   : > { %v338_v44 = vld [vmem:[%s216_s18] sm:$0xff] (%p550_p5) }
  0xbd   : > { %314 = vst [vmem:[%s216_s18 + $0x10] sm:$0xf] %v310_v42  ;;  %v340_v45 = vld [vmem:[%s216_s18 + $0x8] sm:$0xff] (%p550_p5) }
  0xbe   : > { %315 = vst [vmem:[%s216_s18 + $0x18] sm:$0xf] %v311_v43 }
  0xbf   : > { %339 = vst [vmem:[%s325_s23] sm:$0xff] %v338_v44 }
  0xc0   : > { %341 = vst [vmem:[%s325_s23 + $0x8] sm:$0xff] %v340_v45 }
  0xc4   : > { %v342_v46 = vld [vmem:[%s216_s18 + $0x10] sm:$0xff] }
  0xc5   : > { %v344_v47 = vld [vmem:[%s216_s18 + $0x18] sm:$0xff]  ;;  %343 = vst [vmem:[%s325_s23 + $0x20] sm:$0xff] %v342_v46 }
  0xc6   : > { %345 = vst [vmem:[%s325_s23 + $0x28] sm:$0xff] %v344_v47 }
  0xc7 PF: > { %p10_p10 = scmp.ge.s32.totalorder %s537_s16, 4   ;;  %s601_s12 = smov %s493_s13 }
  0xc8   : > { %s602_s13 = smov %s548_s19  ;;  %s603_s14 = smov %s537_s16 }
  0xc9   :  { %12 = sbr.rel (!%p10_p10) target bundleno = 2 (0x2), region = 128 }

// kernel: generator_forward.27
= control target key start
LH: loop header
LB: loop body
LE: loop exit
PB: predicated region body
PF: predicated region fallthrough
CT: control target
= control target key end

     0   :  { %s490_s12 = smov 0   ;;  %s535_s0 = inlined_call_operand.vmem [shape: bf16[3,3], index: 0, kind: input, shape index: {}]   ;;  %s536_s1 = inlined_call_operand.vmem [shape: bf16[3,2048], index: 1, kind: input, shape index: {}]   ;;  %s537_s2 = inlined_call_operand.vmem [shape: f32[3,1], index: 2, kind: input, shape index: {}]   ;;  %s538_s3 = inlined_call_operand.vmem [shape: f32[3,2048], index: 3, kind: output, shape index: {}]  }
   0x1 LB: > { %s414_s13 = sadd.s32 4294967295, %s466_s12   ;;  %p418_p0 = scmp.ge.s32.totalorder %s466_s12, 1  ;;  %s466_s12 = sphi %s490_s12, %s13_s12  }
   0x2   : > { %p138_p1 = scmp.lt.s32.totalorder %s466_s12, 3 }
   0x4   : > { %p139_p2 = pnand %p418_p0, %p138_p1 }
   0x5   : > { %s419_s14 = sshll.u32 (!%p139_p2), %s414_s13, 3 }
   0x6   : > { %142 = sbr.rel (%p139_p2) target bundleno = 190 (0xbe), region = 32  ;;  %p163_p3 = scmp.lt.s32.totalorder (!%p139_p2), %s419_s14, 15 }
   0xb   : > { %v468_v0 = vmov 0   ;;  %s540_s14 = smov (!%p163_p3, %s419_s14), 15  ;;  %v178_v1 = vld [vmem:[%s537_s2] sm:$0x7]  ;;  %vm201_vm0 = vcmask 1040384   ;;  %vm202_vm1 = vcmask 1041408  }
   0xc   : > { %443 = vset.pattern.permute.xlu0 %v468_v0  ;;  %s420_s15 = sshll.u32 %s540_s14, 1  ;;  %v469_v4 = vmov 65535   ;;  %vm197_vm2 = vcmask 23552   ;;  %v175_v13 = vld [vmem:[%s535_s0] sm:$0x3]  ;;  %s422_s23 = sshll.u32 %s540_s14, 2 }
   0xd   : > { %s166_s18 = scalar_lea.vmem %s536_s1, %s420_s15  ;;  %181 = vperm.xlu0 %443, %v178_v1   ;;  %v203_v5 = vsel %vm201_vm0, 4294967295, %v469_v4  ;;  %vm345_vm3 = vcmask 1043456   ;;  %s522_s26 = scalar_lea.vmem %s538_s3, %s422_s23 }
   0xe   : > { %v176_v2 = vld [vmem:[%s166_s18] sm:$0xff]  ;;  %v177_v3 = vld [vmem:[%s166_s18 + $0x8] sm:$0xff]  ;;  %v204_v6 = vsel %vm202_vm1, %v203_v5, 0 }
   0xf   : > { %185 = vst [vmem:[#allocation1] ss:$4 sm:$0xff] %v176_v2 }
  0x10   : > { %188 = vst [vmem:[#allocation1 + $0x20] ss:$4 sm:$0xff] %v177_v3 }
  0x16   : > { %v189_v7 = vld.sshfl [vmem:[#allocation1] sm:$0xff pattern:$0x73625140]  ;;  %v190_v8 = vld.sshfl [vmem:[#allocation1 + $0x8] sm:$0xff pattern:$0x73625140] }
  0x17   : > { %v205_v9 = vand.u32 %v204_v6, %v189_v7  ;;  %v207_v10 = vand.u32 %v204_v6, %v190_v8  ;;  %v191_v11 = vld.sshfl [vmem:[#allocation1 + $0x10] sm:$0xff pattern:$0x73625140]  ;;  %v192_v12 = vld.sshfl [vmem:[#allocation1 + $0x18] sm:$0xff pattern:$0x73625140] }
  0x18   : > { %v209_v14 = vand.u32 %v204_v6, %v191_v11  ;;  %v211_v15 = vand.u32 %v204_v6, %v192_v12  ;;  %v196_v16 = vld.sshfl [vmem:[#allocation1 + $0x38] sm:$0xff pattern:$0x73625140]  ;;  %v195_v17 = vld.sshfl [vmem:[#allocation1 + $0x30] sm:$0xff pattern:$0x73625140] }
  0x19   : > { %228 = vmatpush.bf16.msra.mxu0 %v205_v9  ;;  %241 = vmatpush.bf16.msra.mxu1 %v207_v10  ;;  %v219_v18 = vand.u32 %v204_v6, %v196_v16  ;;  %v217_v19 = vand.u32 %v204_v6, %v195_v17  ;;  %v194_v20 = vld.sshfl [vmem:[#allocation1 + $0x28] sm:$0xff pattern:$0x73625140]  ;;  %v193_v21 = vld.sshfl [vmem:[#allocation1 + $0x20] sm:$0xff pattern:$0x73625140] }
  0x1a   : > { %254 = vmatpush.bf16.msra.mxu2 %v209_v14  ;;  %267 = vmatpush.bf16.msra.mxu3 %v211_v15  ;;  %v215_v22 = vand.u32 %v204_v6, %v194_v20  ;;  %v213_v23 = vand.u32 %v204_v6, %v193_v21 }
  0x1c   : > { %423 = vmatmul.msk.bf16.vlgmr.msra.gmra.mxu0 %vm197_vm2, %v175_v13  ;;  %424 = vmatmul.msk.bf16.vlgmr.msra.gmra.mxu1 %vm197_vm2, %v175_v13 }
  0x1d   : > { %425 = vmatmul.msk.bf16.vlgmr.msra.gmra.mxu2 %vm197_vm2, %v175_v13  ;;  %426 = vmatmul.msk.bf16.vlgmr.msra.gmra.mxu3 %vm197_vm2, %v175_v13 }
  0x1e   : > { %319 = vmatpush.bf16.msrb.mxu3 %v219_v18  ;;  %306 = vmatpush.bf16.msrb.mxu2 %v217_v19 }
  0x1f   : > { %293 = vmatpush.bf16.msrb.mxu1 %v215_v22  ;;  %280 = vmatpush.bf16.msrb.mxu0 %v213_v23 }
  0x2c   : > { %427 = vmatmul.msk.bf16.vlgmr.msrb.gmra.mxu0 %vm197_vm2, %v175_v13  ;;  %428 = vmatmul.msk.bf16.vlgmr.msrb.gmra.mxu1 %vm197_vm2, %v175_v13 }
  0x2d   : > { %429 = vmatmul.msk.bf16.vlgmr.msrb.gmra.mxu2 %vm197_vm2, %v175_v13  ;;  %430 = vmatmul.msk.bf16.vlgmr.msrb.gmra.mxu3 %vm197_vm2, %v175_v13 }
  0x7f   : > { %v182_v24 = vpop.permute.xlu0 %181 }
  0x99   : > { %v230_v25 = vpop.f32.mrf.mxu0  ;;  %v243_v26 = vpop.f32.mrf.mxu1 }
  0x9a   : > { %v231_v27 = vadd.f32 %v230_v25, %v182_v24  ;;  %v244_v28 = vadd.f32 %v243_v26, %v182_v24 }
  0x9c   : > { %444 = vtanh.f32 %v231_v27 }
  0x9d   : > { %446 = vtanh.f32 %v244_v28 }
  0xa0   : > { %v256_v29 = vpop.f32.mrf.mxu2  ;;  %v269_v30 = vpop.f32.mrf.mxu3 }
  0xa1   : > { %v257_v31 = vadd.f32 %v256_v29, %v182_v24  ;;  %v270_v32 = vadd.f32 %v269_v30, %v182_v24  ;;  %v232_v33 = vpop.f32.mrf.mxu0  ;;  %v245_v34 = vpop.f32.mrf.mxu1 }
  0xa2   : > { %v445_v35 = vpop.eup %444 }
  0xa3   : > { %v447_v36 = vpop.eup %446  ;;  %448 = vtanh.f32 %v257_v31 }
  0xa4   : > { %v341_v37 = vrot.slane %v447_v36, 4  ;;  %450 = vtanh.f32 %v270_v32 }
  0xa6   : > { %v346_v38 = vsel %vm345_vm3, %v445_v35, %v341_v37 }
  0xa7   : > { %354 = vst [vmem:[%s522_s26] sm:$0x77] %v346_v38 }
  0xa8   : > { %v258_v39 = vpop.f32.mrf.mxu2  ;;  %v271_v40 = vpop.f32.mrf.mxu3 }
  0xa9   : > { %v449_v41 = vpop.eup %448  ;;  %v282_v42 = vpop.f32.mrf.mxu0 }
  0xaa   : > { %v295_v43 = vpop.f32.mrf.mxu1  ;;  %v451_v44 = vpop.eup %450  ;;  %v283_v45 = vadd.f32 %v282_v42, %v182_v24 }
  0xab   : > { %v296_v46 = vadd.f32 %v295_v43, %v182_v24  ;;  %v342_v47 = vrot.slane %v451_v44, 4 }
  0xac   : > { %452 = vtanh.f32 %v283_v45 }
  0xad   : > { %v347_v48 = vsel %vm345_vm3, %v449_v41, %v342_v47  ;;  %454 = vtanh.f32 %v296_v46 }
  0xae   : > { %355 = vst [vmem:[%s522_s26 + $0x8] sm:$0x77] %v347_v48 }
  0xb0   : > { %v308_v49 = vpop.f32.mrf.mxu2  ;;  %v321_v50 = vpop.f32.mrf.mxu3 }
  0xb1   : > { %v322_v51 = vadd.f32 %v321_v50, %v182_v24  ;;  %v284_v52 = vpop.f32.mrf.mxu0  ;;  %v309_v55 = vadd.f32 %v308_v49, %v182_v24 }
  0xb2   : > { %v297_v53 = vpop.f32.mrf.mxu1  ;;  %v453_v54 = vpop.eup %452 }
  0xb3   : > { %v455_v56 = vpop.eup %454  ;;  %456 = vtanh.f32 %v322_v51 }
  0xb4   : > { %v343_v57 = vrot.slane %v455_v56, 4  ;;  %458 = vtanh.f32 %v309_v55 }
  0xb6   : > { %v348_v58 = vsel %vm345_vm3, %v453_v54, %v343_v57 }
  0xb7   : > { %356 = vst [vmem:[%s522_s26 + $0x10] sm:$0x77] %v348_v58 }
  0xb8   : > { %v310_v59 = vpop.f32.mrf.mxu2  ;;  %v323_v60 = vpop.f32.mrf.mxu3 }
  0xb9   : > { %v457_v61 = vpop.eup %456 }
  0xba   : > { %v344_v62 = vrot.slane %v457_v61, 4  ;;  %v459_v63 = vpop.eup %458 }
  0xbc   : > { %v349_v0 = vsel %vm345_vm3, %v459_v63, %v344_v62 }
  0xbd   : > { %357 = vst [vmem:[%s522_s26 + $0x18] sm:$0x77] %v349_v0 }
  0xbe PF: > { %s13_s12 = sadd.s32 1, %s466_s12  }
  0xbf   : > { %p10_p4 = scmp.ge.s32.totalorder %s13_s12, 4  }
  0xc1   :  { %12 = sbr.rel (!%p10_p4) target bundleno = 1 (0x1), region = 63 }

</bundles_post_ra>
